<compile_context>
chip_gen: v6e
topology: v6e:2x2x1
jax: 0.10.0
libtpu: 0.0.40
codegen_flags: <defaults>
</compile_context>

<pallas_src>
import functools

import jax
import jax.numpy as jnp
from jax.experimental import pallas as pl
from jax.experimental.pallas import tpu as pltpu


def _round_up(x, m):
    return (x + m - 1) // m * m


def _gnn_fused_kernel(a_in_ref, a_out_ref, h_ref,
                      w_e_t_ref, b_e_ref,
                      b_iah_ref, b_oah_ref,
                      w_ih_in_t_ref, w_ih_out_t_ref, b_ih_ref,
                      w_hh_t_ref, b_hh_ref,
                      out_ref, *, num_steps):
    _, M, Hp = h_ref.shape
    cdt = w_e_t_ref.dtype          # compute dtype for weight-matmul operands

    def cast(x):
        return x if x.dtype == cdt else x.astype(cdt)

    def mm(x, w_ref):
        # (M, Hp) @ (Hp, k*Hp) on the MXU, f32 accumulation.
        return jnp.dot(x, w_ref[...], preferred_element_type=jnp.float32)

    def step_body(_, h):
        h_c = cast(h)

        # Fused edge linears: one (M, Hp) @ (Hp, 2Hp) matmul.
        eh = mm(h_c, w_e_t_ref) + b_e_ref[...]              # (M, 2Hp) f32
        eh_in = eh[:, :Hp]
        eh_out = eh[:, Hp:]

        # Block-diagonal adjacency aggregation (f32 operands, f32 accumulate).
        input_in = jnp.dot(a_in_ref[0], eh_in,
                           preferred_element_type=jnp.float32) + b_iah_ref[...]
        input_out = jnp.dot(a_out_ref[0], eh_out,
                            preferred_element_type=jnp.float32) + b_oah_ref[...]
        ii_c = cast(input_in)
        io_c = cast(input_out)

        # Fused gate matmuls: three (M, Hp) @ (Hp, 3Hp) launches per step.
        gi = mm(ii_c, w_ih_in_t_ref) + mm(io_c, w_ih_out_t_ref) + b_ih_ref[...]
        gh = mm(h_c, w_hh_t_ref) + b_hh_ref[...]

        # 128-aligned lane slices -> free vreg views.
        i_r, i_i, i_n = gi[:, :Hp], gi[:, Hp:2 * Hp], gi[:, 2 * Hp:]
        h_r, h_i, h_n = gh[:, :Hp], gh[:, Hp:2 * Hp], gh[:, 2 * Hp:]

        resetgate = jax.nn.sigmoid(i_r + h_r)
        inputgate = jax.nn.sigmoid(i_i + h_i)
        newgate = jnp.tanh(i_n + resetgate * h_n)
        return newgate + inputgate * (h - newgate)

    h = h_ref[0].astype(jnp.float32)                        # (M, Hp) resident carry
    if num_steps <= 8:
        for _ in range(num_steps):                          # fully unrolled
            h = step_body(0, h)
    else:
        h = jax.lax.fori_loop(0, num_steps, step_body, h)   # bounded live ranges

    out_ref[0] = h.astype(out_ref.dtype)


def gnn_forward_pallas(A, hidden, params, *, step=1,
                       compute_dtype=jnp.bfloat16, batch_tile=None):
    """GNN.forward (SR-GNN cell, `step` iterations) as one fused pallas_call.

    params = (w_ih, w_hh, b_ih, b_hh, b_iah, b_oah,
              w_ein, b_ein, w_eout, b_eout)  in PyTorch shape conventions.
    Weight matmuls use `compute_dtype` MXU operands (f32 accumulation);
    the adjacency aggregation and gate math stay in f32.
    """
    (w_ih, w_hh, b_ih, b_hh, b_iah, b_oah,
     w_ein, b_ein, w_eout, b_eout) = params

    B, N, H = hidden.shape
    assert A.shape == (B, N, 2 * N)
    assert step >= 1

    Hp = _round_up(H, 128)          # lane-dense hidden width
    f32 = jnp.float32
    cdt = compute_dtype

    # ---- batch tile: target ~256 rows per matmul, keep >=2 grid steps ----
    if batch_tile is None:
        cap = max(1, 256 // N)
        divs = [d for d in range(1, B + 1) if B % d == 0 and d <= cap]
        divs2 = [d for d in divs if B // d >= 2]     # grid >= 2 (megacore)
        batch_tile = max(divs2) if divs2 else max(divs)
    Bt = batch_tile
    assert B % Bt == 0
    G = B // Bt                     # grid size
    M = Bt * N                      # rows per weight matmul

    # ---- weight / bias prep: pre-split, pre-transpose, zero-pad, fuse ----
    def pad2(w):                    # (h, w) -> (Hp, Hp) zero-padded
        return jnp.pad(w, ((0, Hp - w.shape[0]), (0, Hp - w.shape[1])))

    def pad1(b):                    # (h,) -> (Hp,) zero-padded
        return jnp.pad(b, (0, Hp - b.shape[0]))

    w_e_t = jnp.concatenate([pad2(w_ein.T), pad2(w_eout.T)], axis=1).astype(cdt)          # (Hp, 2Hp)
    w_ih_in_t = jnp.concatenate(
        [pad2(w_ih[g * H:(g + 1) * H, :H].T) for g in range(3)], axis=1).astype(cdt)       # (Hp, 3Hp)
    w_ih_out_t = jnp.concatenate(
        [pad2(w_ih[g * H:(g + 1) * H, H:2 * H].T) for g in range(3)], axis=1).astype(cdt)  # (Hp, 3Hp)
    w_hh_t = jnp.concatenate(
        [pad2(w_hh[g * H:(g + 1) * H, :].T) for g in range(3)], axis=1).astype(cdt)        # (Hp, 3Hp)

    b_e = jnp.concatenate([pad1(b_ein), pad1(b_eout)])[None, :].astype(f32)                # (1, 2Hp)
    b_iah_p = pad1(b_iah)[None, :].astype(f32)                                             # (1, Hp)
    b_oah_p = pad1(b_oah)[None, :].astype(f32)
    b_ih_p = jnp.concatenate(
        [pad1(b_ih[g * H:(g + 1) * H]) for g in range(3)])[None, :].astype(f32)            # (1, 3Hp)
    b_hh_p = jnp.concatenate(
        [pad1(b_hh[g * H:(g + 1) * H]) for g in range(3)])[None, :].astype(f32)

    # ---- adjacency: split halves, build block-diagonal (G, M, M) in f32 ----
    def block_diag(a):              # (B, N, N) -> (G, M, M)
        a4 = a.reshape(G, Bt, N, N)
        eye = jnp.eye(Bt, dtype=a.dtype)
        bd = jnp.einsum('gbij,bc->gbicj', a4, eye)
        return bd.reshape(G, M, M)

    a_in_bd = block_diag(A[:, :, :N].astype(f32))
    a_out_bd = block_diag(A[:, :, N:2 * N].astype(f32))

    # ---- hidden: zero-pad lanes, flatten batch tile into rows ----
    hidden_p = jnp.pad(hidden.astype(f32),
                       ((0, 0), (0, 0), (0, Hp - H))).reshape(G, M, Hp)

    out_dtype = hidden.dtype

    # ---- BlockSpecs ----
    def const_spec(arr):            # grid-invariant 2-D weight / bias
        return pl.BlockSpec(arr.shape, lambda g: (0, 0))

    def batched_spec(shape):        # per-grid-step batch tile
        return pl.BlockSpec(shape, lambda g: (g, 0, 0))

    grid_spec = pltpu.PrefetchScalarGridSpec(
        num_scalar_prefetch=0,
        grid=(G,),
        in_specs=[
            batched_spec((1, M, M)),        # a_in (block-diag)
            batched_spec((1, M, M)),        # a_out (block-diag)
            batched_spec((1, M, Hp)),       # hidden
            const_spec(w_e_t), const_spec(b_e),
            const_spec(b_iah_p), const_spec(b_oah_p),
            const_spec(w_ih_in_t), const_spec(w_ih_out_t), const_spec(b_ih_p),
            const_spec(w_hh_t), const_spec(b_hh_p),
        ],
        out_specs=pl.BlockSpec((1, M, Hp), lambda g: (g, 0, 0)),
    )

    out = pl.pallas_call(
        functools.partial(_gnn_fused_kernel, num_steps=step),
        out_shape=jax.ShapeDtypeStruct((G, M, Hp), out_dtype),
        grid_spec=grid_spec,
        compiler_params=pltpu.CompilerParams(
            dimension_semantics=("parallel",),
            vmem_limit_bytes=64 * 1024 * 1024),
    )(a_in_bd, a_out_bd, hidden_p,
      w_e_t, b_e, b_iah_p, b_oah_p,
      w_ih_in_t, w_ih_out_t, b_ih_p, w_hh_t, b_hh_p)

    return out.reshape(B, N, Hp)[:, :, :H]


# --------------------- pure-JAX reference (mirrors the PyTorch module) ---------------------
def gnn_forward_ref(A, hidden, params, step=1):
    (w_ih, w_hh, b_ih, b_hh, b_iah, b_oah,
     w_ein, b_ein, w_eout, b_eout) = params
    N = A.shape[1]
    H = hidden.shape[2]
    for _ in range(step):
        eh_in = jnp.einsum('bnh,oh->bno', hidden, w_ein) + b_ein
        eh_out = jnp.einsum('bnh,oh->bno', hidden, w_eout) + b_eout
        input_in = jnp.matmul(A[:, :, :N], eh_in) + b_iah
        input_out = jnp.matmul(A[:, :, N:2 * N], eh_out) + b_oah
        inputs = jnp.concatenate([input_in, input_out], axis=2)
        gi = jnp.einsum('bni,oi->bno', inputs, w_ih) + b_ih
        gh = jnp.einsum('bnh,oh->bno', hidden, w_hh) + b_hh
        i_r, i_i, i_n = gi[..., :H], gi[..., H:2 * H], gi[..., 2 * H:]
        h_r, h_i, h_n = gh[..., :H], gh[..., H:2 * H], gh[..., 2 * H:]
        resetgate = jax.nn.sigmoid(i_r + h_r)
        inputgate = jax.nn.sigmoid(i_i + h_i)
        newgate = jnp.tanh(i_n + resetgate * h_n)
        hidden = newgate + inputgate * (hidden - newgate)
    return hidden


if __name__ == "__main__":
    B, N, H = 2, 8, 32
    step = 2
    key = jax.random.PRNGKey(0)
    ks = jax.random.split(key, 12)

    stdv = 1.0 / jnp.sqrt(H)

    def u(k, shape):
        return jax.random.uniform(k, shape, jnp.float32, -stdv, stdv)

    # Parameters (PyTorch shape conventions).
    w_ih = u(ks[0], (3 * H, 2 * H))
    w_hh = u(ks[1], (3 * H, H))
    b_ih = u(ks[2], (3 * H,))
    b_hh = u(ks[3], (3 * H,))
    b_iah = u(ks[4], (H,))
    b_oah = u(ks[5], (H,))
    w_ein = u(ks[6], (H, H))
    b_ein = u(ks[7], (H,))
    w_eout = u(ks[8], (H, H))
    b_eout = u(ks[9], (H,))

    # Inputs.
    A = jax.random.uniform(ks[10], (B, N, 2 * N), jnp.float32)
    hidden = jax.random.normal(ks[11], (B, N, H), jnp.float32)

    params = (w_ih, w_hh, b_ih, b_hh, b_iah, b_oah,
              w_ein, b_ein, w_eout, b_eout)

    ref = gnn_forward_ref(A, hidden, params, step=step)

    # f32 compute path (tolerance absorbs summation-order / padding reordering).
    out_f32 = jax.block_until_ready(
        gnn_forward_pallas(A, hidden, params, step=step,
                           compute_dtype=jnp.float32))
    assert out_f32.shape == (B, N, H)
    assert jnp.allclose(out_f32, ref, atol=2e-3, rtol=2e-3), "f32 kernel mismatch"

    # bf16 MXU-operand path (f32 adjacency aggregation / accumulation / gates).
    out_bf16 = jax.block_until_ready(
        gnn_forward_pallas(A, hidden, params, step=step,
                           compute_dtype=jnp.bfloat16))
    assert out_bf16.shape == (B, N, H)
    assert jnp.allclose(out_bf16, ref, atol=1e-1, rtol=1e-1), "bf16 kernel mismatch"

    print("KERNEL_OK")
</pallas_src>

<mosaic_0001>
module attributes {stable_mosaic.version = 11 : i64} {
  func.func @_gnn_fused_kernel(%arg0: i32, %arg1: memref<1x8x8xf32, #tpu.memory_space<vmem>>, %arg2: memref<1x8x8xf32, #tpu.memory_space<vmem>>, %arg3: memref<1x8x128xf32, #tpu.memory_space<vmem>>, %arg4: memref<128x256xf32, #tpu.memory_space<vmem>>, %arg5: memref<1x256xf32, #tpu.memory_space<vmem>>, %arg6: memref<1x128xf32, #tpu.memory_space<vmem>>, %arg7: memref<1x128xf32, #tpu.memory_space<vmem>>, %arg8: memref<128x384xf32, #tpu.memory_space<vmem>>, %arg9: memref<128x384xf32, #tpu.memory_space<vmem>>, %arg10: memref<1x384xf32, #tpu.memory_space<vmem>>, %arg11: memref<128x384xf32, #tpu.memory_space<vmem>>, %arg12: memref<1x384xf32, #tpu.memory_space<vmem>>, %arg13: memref<1x8x128xf32, #tpu.memory_space<vmem>>) attributes {dimension_semantics = [#tpu.dimension_semantics<parallel>], iteration_bounds = array<i64: 2>, scalar_prefetch = 0 : i64, scratch_operands = 0 : i64, tpu.core_type = #tpu.core_type<tc>, window_params = [{transform_indices = @transform_0, window_bounds = array<i64: 1, 8, 8>}, {transform_indices = @transform_1, window_bounds = array<i64: 1, 8, 8>}, {transform_indices = @transform_2, window_bounds = array<i64: 1, 8, 128>}, {pipeline_mode = #tpu.pipeline_mode<synchronous>, transform_indices = @transform_3, window_bounds = array<i64: 128, 256>}, {pipeline_mode = #tpu.pipeline_mode<synchronous>, transform_indices = @transform_4, window_bounds = array<i64: 1, 256>}, {pipeline_mode = #tpu.pipeline_mode<synchronous>, transform_indices = @transform_5, window_bounds = array<i64: 1, 128>}, {pipeline_mode = #tpu.pipeline_mode<synchronous>, transform_indices = @transform_6, window_bounds = array<i64: 1, 128>}, {pipeline_mode = #tpu.pipeline_mode<synchronous>, transform_indices = @transform_7, window_bounds = array<i64: 128, 384>}, {pipeline_mode = #tpu.pipeline_mode<synchronous>, transform_indices = @transform_8, window_bounds = array<i64: 128, 384>}, {pipeline_mode = #tpu.pipeline_mode<synchronous>, transform_indices = @transform_9, window_bounds = array<i64: 1, 384>}, {pipeline_mode = #tpu.pipeline_mode<synchronous>, transform_indices = @transform_10, window_bounds = array<i64: 128, 384>}, {pipeline_mode = #tpu.pipeline_mode<synchronous>, transform_indices = @transform_11, window_bounds = array<i64: 1, 384>}, {transform_indices = @transform_12, window_bounds = array<i64: 1, 8, 128>}]} {
    %c0 = arith.constant 0 : index
    %c0_0 = arith.constant 0 : index
    %c0_1 = arith.constant 0 : index
    %0 = vector.load %arg3[%c0, %c0_0, %c0_1] : memref<1x8x128xf32, #tpu.memory_space<vmem>>, vector<1x8x128xf32>
    %1 = vector.shape_cast %0 : vector<1x8x128xf32> to vector<8x128xf32>
    %c0_2 = arith.constant 0 : index
    %c0_3 = arith.constant 0 : index
    %2 = vector.load %arg4[%c0_2, %c0_3] : memref<128x256xf32, #tpu.memory_space<vmem>>, vector<128x256xf32>
    %cst = arith.constant dense<0.000000e+00> : vector<8x256xf32>
    %3 = tpu.matmul %1, %2, %cst {dimension_numbers = #tpu.dot_dimension_numbers<[1], [0], [0], [1], [0, 0, 1, 1], [], []>} : vector<8x128xf32>, vector<128x256xf32>, vector<8x256xf32> -> vector<8x256xf32>
    %c0_4 = arith.constant 0 : index
    %c0_5 = arith.constant 0 : index
    %4 = vector.load %arg5[%c0_4, %c0_5] : memref<1x256xf32, #tpu.memory_space<vmem>>, vector<1x256xf32>
    %5 = vector.broadcast %4 : vector<1x256xf32> to vector<8x256xf32>
    %6 = arith.addf %3, %5 : vector<8x256xf32>
    %7 = vector.extract_strided_slice %6 {offsets = [0, 0], sizes = [8, 128], strides = [1, 1]} : vector<8x256xf32> to vector<8x128xf32>
    %8 = vector.extract_strided_slice %6 {offsets = [0, 128], sizes = [8, 128], strides = [1, 1]} : vector<8x256xf32> to vector<8x128xf32>
    %c0_6 = arith.constant 0 : index
    %c0_7 = arith.constant 0 : index
    %c0_8 = arith.constant 0 : index
    %9 = vector.load %arg1[%c0_6, %c0_7, %c0_8] : memref<1x8x8xf32, #tpu.memory_space<vmem>>, vector<1x8x8xf32>
    %10 = vector.shape_cast %9 : vector<1x8x8xf32> to vector<8x8xf32>
    %cst_9 = arith.constant dense<0.000000e+00> : vector<8x128xf32>
    %11 = tpu.matmul %10, %7, %cst_9 {dimension_numbers = #tpu.dot_dimension_numbers<[1], [0], [0], [1], [0, 0, 1, 1], [], []>} : vector<8x8xf32>, vector<8x128xf32>, vector<8x128xf32> -> vector<8x128xf32>
    %c0_10 = arith.constant 0 : index
    %c0_11 = arith.constant 0 : index
    %12 = vector.load %arg6[%c0_10, %c0_11] : memref<1x128xf32, #tpu.memory_space<vmem>>, vector<1x128xf32>
    %13 = vector.broadcast %12 : vector<1x128xf32> to vector<8x128xf32>
    %14 = arith.addf %11, %13 : vector<8x128xf32>
    %c0_12 = arith.constant 0 : index
    %c0_13 = arith.constant 0 : index
    %c0_14 = arith.constant 0 : index
    %15 = vector.load %arg2[%c0_12, %c0_13, %c0_14] : memref<1x8x8xf32, #tpu.memory_space<vmem>>, vector<1x8x8xf32>
    %16 = vector.shape_cast %15 : vector<1x8x8xf32> to vector<8x8xf32>
    %cst_15 = arith.constant dense<0.000000e+00> : vector<8x128xf32>
    %17 = tpu.matmul %16, %8, %cst_15 {dimension_numbers = #tpu.dot_dimension_numbers<[1], [0], [0], [1], [0, 0, 1, 1], [], []>} : vector<8x8xf32>, vector<8x128xf32>, vector<8x128xf32> -> vector<8x128xf32>
    %c0_16 = arith.constant 0 : index
    %c0_17 = arith.constant 0 : index
    %18 = vector.load %arg7[%c0_16, %c0_17] : memref<1x128xf32, #tpu.memory_space<vmem>>, vector<1x128xf32>
    %19 = vector.broadcast %18 : vector<1x128xf32> to vector<8x128xf32>
    %20 = arith.addf %17, %19 : vector<8x128xf32>
    %c0_18 = arith.constant 0 : index
    %c0_19 = arith.constant 0 : index
    %21 = vector.load %arg8[%c0_18, %c0_19] : memref<128x384xf32, #tpu.memory_space<vmem>>, vector<128x384xf32>
    %cst_20 = arith.constant dense<0.000000e+00> : vector<8x384xf32>
    %22 = tpu.matmul %14, %21, %cst_20 {dimension_numbers = #tpu.dot_dimension_numbers<[1], [0], [0], [1], [0, 0, 1, 1], [], []>} : vector<8x128xf32>, vector<128x384xf32>, vector<8x384xf32> -> vector<8x384xf32>
    %c0_21 = arith.constant 0 : index
    %c0_22 = arith.constant 0 : index
    %23 = vector.load %arg9[%c0_21, %c0_22] : memref<128x384xf32, #tpu.memory_space<vmem>>, vector<128x384xf32>
    %cst_23 = arith.constant dense<0.000000e+00> : vector<8x384xf32>
    %24 = tpu.matmul %20, %23, %cst_23 {dimension_numbers = #tpu.dot_dimension_numbers<[1], [0], [0], [1], [0, 0, 1, 1], [], []>} : vector<8x128xf32>, vector<128x384xf32>, vector<8x384xf32> -> vector<8x384xf32>
    %25 = arith.addf %22, %24 : vector<8x384xf32>
    %c0_24 = arith.constant 0 : index
    %c0_25 = arith.constant 0 : index
    %26 = vector.load %arg10[%c0_24, %c0_25] : memref<1x384xf32, #tpu.memory_space<vmem>>, vector<1x384xf32>
    %27 = vector.broadcast %26 : vector<1x384xf32> to vector<8x384xf32>
    %28 = arith.addf %25, %27 : vector<8x384xf32>
    %c0_26 = arith.constant 0 : index
    %c0_27 = arith.constant 0 : index
    %29 = vector.load %arg11[%c0_26, %c0_27] : memref<128x384xf32, #tpu.memory_space<vmem>>, vector<128x384xf32>
    %cst_28 = arith.constant dense<0.000000e+00> : vector<8x384xf32>
    %30 = tpu.matmul %1, %29, %cst_28 {dimension_numbers = #tpu.dot_dimension_numbers<[1], [0], [0], [1], [0, 0, 1, 1], [], []>} : vector<8x128xf32>, vector<128x384xf32>, vector<8x384xf32> -> vector<8x384xf32>
    %c0_29 = arith.constant 0 : index
    %c0_30 = arith.constant 0 : index
    %31 = vector.load %arg12[%c0_29, %c0_30] : memref<1x384xf32, #tpu.memory_space<vmem>>, vector<1x384xf32>
    %32 = vector.broadcast %31 : vector<1x384xf32> to vector<8x384xf32>
    %33 = arith.addf %30, %32 : vector<8x384xf32>
    %34 = vector.extract_strided_slice %28 {offsets = [0, 0], sizes = [8, 128], strides = [1, 1]} : vector<8x384xf32> to vector<8x128xf32>
    %35 = vector.extract_strided_slice %28 {offsets = [0, 128], sizes = [8, 128], strides = [1, 1]} : vector<8x384xf32> to vector<8x128xf32>
    %36 = vector.extract_strided_slice %28 {offsets = [0, 256], sizes = [8, 128], strides = [1, 1]} : vector<8x384xf32> to vector<8x128xf32>
    %37 = vector.extract_strided_slice %33 {offsets = [0, 0], sizes = [8, 128], strides = [1, 1]} : vector<8x384xf32> to vector<8x128xf32>
    %38 = vector.extract_strided_slice %33 {offsets = [0, 128], sizes = [8, 128], strides = [1, 1]} : vector<8x384xf32> to vector<8x128xf32>
    %39 = vector.extract_strided_slice %33 {offsets = [0, 256], sizes = [8, 128], strides = [1, 1]} : vector<8x384xf32> to vector<8x128xf32>
    %40 = arith.addf %34, %37 : vector<8x128xf32>
    %41 = arith.negf %40 : vector<8x128xf32>
    %42 = math.exp %41 : vector<8x128xf32>
    %cst_31 = arith.constant 1.000000e+00 : f32
    %43 = vector.broadcast %cst_31 : f32 to vector<8x128xf32>
    %44 = arith.addf %43, %42 : vector<8x128xf32>
    %45 = arith.divf %43, %44 : vector<8x128xf32>
    %46 = arith.addf %35, %38 : vector<8x128xf32>
    %47 = arith.negf %46 : vector<8x128xf32>
    %48 = math.exp %47 : vector<8x128xf32>
    %cst_32 = arith.constant 1.000000e+00 : f32
    %49 = vector.broadcast %cst_32 : f32 to vector<8x128xf32>
    %50 = arith.addf %49, %48 : vector<8x128xf32>
    %51 = arith.divf %49, %50 : vector<8x128xf32>
    %52 = arith.mulf %45, %39 : vector<8x128xf32>
    %53 = arith.addf %36, %52 : vector<8x128xf32>
    %54 = math.tanh %53 : vector<8x128xf32>
    %55 = arith.subf %1, %54 : vector<8x128xf32>
    %56 = arith.mulf %51, %55 : vector<8x128xf32>
    %57 = arith.addf %54, %56 : vector<8x128xf32>
    %c0_33 = arith.constant 0 : index
    %c0_34 = arith.constant 0 : index
    %58 = vector.load %arg4[%c0_33, %c0_34] : memref<128x256xf32, #tpu.memory_space<vmem>>, vector<128x256xf32>
    %cst_35 = arith.constant dense<0.000000e+00> : vector<8x256xf32>
    %59 = tpu.matmul %57, %58, %cst_35 {dimension_numbers = #tpu.dot_dimension_numbers<[1], [0], [0], [1], [0, 0, 1, 1], [], []>} : vector<8x128xf32>, vector<128x256xf32>, vector<8x256xf32> -> vector<8x256xf32>
    %c0_36 = arith.constant 0 : index
    %c0_37 = arith.constant 0 : index
    %60 = vector.load %arg5[%c0_36, %c0_37] : memref<1x256xf32, #tpu.memory_space<vmem>>, vector<1x256xf32>
    %61 = vector.broadcast %60 : vector<1x256xf32> to vector<8x256xf32>
    %62 = arith.addf %59, %61 : vector<8x256xf32>
    %63 = vector.extract_strided_slice %62 {offsets = [0, 0], sizes = [8, 128], strides = [1, 1]} : vector<8x256xf32> to vector<8x128xf32>
    %64 = vector.extract_strided_slice %62 {offsets = [0, 128], sizes = [8, 128], strides = [1, 1]} : vector<8x256xf32> to vector<8x128xf32>
    %c0_38 = arith.constant 0 : index
    %c0_39 = arith.constant 0 : index
    %c0_40 = arith.constant 0 : index
    %65 = vector.load %arg1[%c0_38, %c0_39, %c0_40] : memref<1x8x8xf32, #tpu.memory_space<vmem>>, vector<1x8x8xf32>
    %66 = vector.shape_cast %65 : vector<1x8x8xf32> to vector<8x8xf32>
    %cst_41 = arith.constant dense<0.000000e+00> : vector<8x128xf32>
    %67 = tpu.matmul %66, %63, %cst_41 {dimension_numbers = #tpu.dot_dimension_numbers<[1], [0], [0], [1], [0, 0, 1, 1], [], []>} : vector<8x8xf32>, vector<8x128xf32>, vector<8x128xf32> -> vector<8x128xf32>
    %c0_42 = arith.constant 0 : index
    %c0_43 = arith.constant 0 : index
    %68 = vector.load %arg6[%c0_42, %c0_43] : memref<1x128xf32, #tpu.memory_space<vmem>>, vector<1x128xf32>
    %69 = vector.broadcast %68 : vector<1x128xf32> to vector<8x128xf32>
    %70 = arith.addf %67, %69 : vector<8x128xf32>
    %c0_44 = arith.constant 0 : index
    %c0_45 = arith.constant 0 : index
    %c0_46 = arith.constant 0 : index
    %71 = vector.load %arg2[%c0_44, %c0_45, %c0_46] : memref<1x8x8xf32, #tpu.memory_space<vmem>>, vector<1x8x8xf32>
    %72 = vector.shape_cast %71 : vector<1x8x8xf32> to vector<8x8xf32>
    %cst_47 = arith.constant dense<0.000000e+00> : vector<8x128xf32>
    %73 = tpu.matmul %72, %64, %cst_47 {dimension_numbers = #tpu.dot_dimension_numbers<[1], [0], [0], [1], [0, 0, 1, 1], [], []>} : vector<8x8xf32>, vector<8x128xf32>, vector<8x128xf32> -> vector<8x128xf32>
    %c0_48 = arith.constant 0 : index
    %c0_49 = arith.constant 0 : index
    %74 = vector.load %arg7[%c0_48, %c0_49] : memref<1x128xf32, #tpu.memory_space<vmem>>, vector<1x128xf32>
    %75 = vector.broadcast %74 : vector<1x128xf32> to vector<8x128xf32>
    %76 = arith.addf %73, %75 : vector<8x128xf32>
    %c0_50 = arith.constant 0 : index
    %c0_51 = arith.constant 0 : index
    %77 = vector.load %arg8[%c0_50, %c0_51] : memref<128x384xf32, #tpu.memory_space<vmem>>, vector<128x384xf32>
    %cst_52 = arith.constant dense<0.000000e+00> : vector<8x384xf32>
    %78 = tpu.matmul %70, %77, %cst_52 {dimension_numbers = #tpu.dot_dimension_numbers<[1], [0], [0], [1], [0, 0, 1, 1], [], []>} : vector<8x128xf32>, vector<128x384xf32>, vector<8x384xf32> -> vector<8x384xf32>
    %c0_53 = arith.constant 0 : index
    %c0_54 = arith.constant 0 : index
    %79 = vector.load %arg9[%c0_53, %c0_54] : memref<128x384xf32, #tpu.memory_space<vmem>>, vector<128x384xf32>
    %cst_55 = arith.constant dense<0.000000e+00> : vector<8x384xf32>
    %80 = tpu.matmul %76, %79, %cst_55 {dimension_numbers = #tpu.dot_dimension_numbers<[1], [0], [0], [1], [0, 0, 1, 1], [], []>} : vector<8x128xf32>, vector<128x384xf32>, vector<8x384xf32> -> vector<8x384xf32>
    %81 = arith.addf %78, %80 : vector<8x384xf32>
    %c0_56 = arith.constant 0 : index
    %c0_57 = arith.constant 0 : index
    %82 = vector.load %arg10[%c0_56, %c0_57] : memref<1x384xf32, #tpu.memory_space<vmem>>, vector<1x384xf32>
    %83 = vector.broadcast %82 : vector<1x384xf32> to vector<8x384xf32>
    %84 = arith.addf %81, %83 : vector<8x384xf32>
    %c0_58 = arith.constant 0 : index
    %c0_59 = arith.constant 0 : index
    %85 = vector.load %arg11[%c0_58, %c0_59] : memref<128x384xf32, #tpu.memory_space<vmem>>, vector<128x384xf32>
    %cst_60 = arith.constant dense<0.000000e+00> : vector<8x384xf32>
    %86 = tpu.matmul %57, %85, %cst_60 {dimension_numbers = #tpu.dot_dimension_numbers<[1], [0], [0], [1], [0, 0, 1, 1], [], []>} : vector<8x128xf32>, vector<128x384xf32>, vector<8x384xf32> -> vector<8x384xf32>
    %c0_61 = arith.constant 0 : index
    %c0_62 = arith.constant 0 : index
    %87 = vector.load %arg12[%c0_61, %c0_62] : memref<1x384xf32, #tpu.memory_space<vmem>>, vector<1x384xf32>
    %88 = vector.broadcast %87 : vector<1x384xf32> to vector<8x384xf32>
    %89 = arith.addf %86, %88 : vector<8x384xf32>
    %90 = vector.extract_strided_slice %84 {offsets = [0, 0], sizes = [8, 128], strides = [1, 1]} : vector<8x384xf32> to vector<8x128xf32>
    %91 = vector.extract_strided_slice %84 {offsets = [0, 128], sizes = [8, 128], strides = [1, 1]} : vector<8x384xf32> to vector<8x128xf32>
    %92 = vector.extract_strided_slice %84 {offsets = [0, 256], sizes = [8, 128], strides = [1, 1]} : vector<8x384xf32> to vector<8x128xf32>
    %93 = vector.extract_strided_slice %89 {offsets = [0, 0], sizes = [8, 128], strides = [1, 1]} : vector<8x384xf32> to vector<8x128xf32>
    %94 = vector.extract_strided_slice %89 {offsets = [0, 128], sizes = [8, 128], strides = [1, 1]} : vector<8x384xf32> to vector<8x128xf32>
    %95 = vector.extract_strided_slice %89 {offsets = [0, 256], sizes = [8, 128], strides = [1, 1]} : vector<8x384xf32> to vector<8x128xf32>
    %96 = arith.addf %90, %93 : vector<8x128xf32>
    %97 = arith.negf %96 : vector<8x128xf32>
    %98 = math.exp %97 : vector<8x128xf32>
    %cst_63 = arith.constant 1.000000e+00 : f32
    %99 = vector.broadcast %cst_63 : f32 to vector<8x128xf32>
    %100 = arith.addf %99, %98 : vector<8x128xf32>
    %101 = arith.divf %99, %100 : vector<8x128xf32>
    %102 = arith.addf %91, %94 : vector<8x128xf32>
    %103 = arith.negf %102 : vector<8x128xf32>
    %104 = math.exp %103 : vector<8x128xf32>
    %cst_64 = arith.constant 1.000000e+00 : f32
    %105 = vector.broadcast %cst_64 : f32 to vector<8x128xf32>
    %106 = arith.addf %105, %104 : vector<8x128xf32>
    %107 = arith.divf %105, %106 : vector<8x128xf32>
    %108 = arith.mulf %101, %95 : vector<8x128xf32>
    %109 = arith.addf %92, %108 : vector<8x128xf32>
    %110 = math.tanh %109 : vector<8x128xf32>
    %111 = arith.subf %57, %110 : vector<8x128xf32>
    %112 = arith.mulf %107, %111 : vector<8x128xf32>
    %113 = arith.addf %110, %112 : vector<8x128xf32>
    %c0_65 = arith.constant 0 : index
    %c0_66 = arith.constant 0 : index
    %c0_67 = arith.constant 0 : index
    %114 = vector.load %arg13[%c0_65, %c0_66, %c0_67] : memref<1x8x128xf32, #tpu.memory_space<vmem>>, vector<1x8x128xf32>
    %115 = vector.shape_cast %114 : vector<1x8x128xf32> to vector<8x128xf32>
    %116 = vector.shape_cast %113 : vector<8x128xf32> to vector<1x8x128xf32>
    tpu.vector_store %arg13[%c0_65, %c0_66, %c0_67], %116 {strides = array<i32>} : memref<1x8x128xf32, #tpu.memory_space<vmem>>, vector<1x8x128xf32>,
    return
  }
  func.func @transform_0(%arg0: i32) -> (i32, i32, i32) {
    %c0_i32 = arith.constant 0 : i32
    %c0_i32_0 = arith.constant 0 : i32
    %c0_i32_1 = arith.constant 0 : i32
    return %arg0, %c0_i32, %c0_i32_0 : i32, i32, i32
  }
  func.func @transform_1(%arg0: i32) -> (i32, i32, i32) {
    %c0_i32 = arith.constant 0 : i32
    %c0_i32_0 = arith.constant 0 : i32
    %c0_i32_1 = arith.constant 0 : i32
    return %arg0, %c0_i32, %c0_i32_0 : i32, i32, i32
  }
  func.func @transform_2(%arg0: i32) -> (i32, i32, i32) {
    %c0_i32 = arith.constant 0 : i32
    %c0_i32_0 = arith.constant 0 : i32
    %c0_i32_1 = arith.constant 0 : i32
    return %arg0, %c0_i32, %c0_i32_0 : i32, i32, i32
  }
  func.func @transform_3(%arg0: i32) -> (i32, i32) {
    %c0_i32 = arith.constant 0 : i32
    %c0_i32_0 = arith.constant 0 : i32
    %c0_i32_1 = arith.constant 0 : i32
    return %c0_i32, %c0_i32_0 : i32, i32
  }
  func.func @transform_4(%arg0: i32) -> (i32, i32) {
    %c0_i32 = arith.constant 0 : i32
    %c0_i32_0 = arith.constant 0 : i32
    %c0_i32_1 = arith.constant 0 : i32
    return %c0_i32, %c0_i32_0 : i32, i32
  }
  func.func @transform_5(%arg0: i32) -> (i32, i32) {
    %c0_i32 = arith.constant 0 : i32
    %c0_i32_0 = arith.constant 0 : i32
    %c0_i32_1 = arith.constant 0 : i32
    return %c0_i32, %c0_i32_0 : i32, i32
  }
  func.func @transform_6(%arg0: i32) -> (i32, i32) {
    %c0_i32 = arith.constant 0 : i32
    %c0_i32_0 = arith.constant 0 : i32
    %c0_i32_1 = arith.constant 0 : i32
    return %c0_i32, %c0_i32_0 : i32, i32
  }
  func.func @transform_7(%arg0: i32) -> (i32, i32) {
    %c0_i32 = arith.constant 0 : i32
    %c0_i32_0 = arith.constant 0 : i32
    %c0_i32_1 = arith.constant 0 : i32
    return %c0_i32, %c0_i32_0 : i32, i32
  }
  func.func @transform_8(%arg0: i32) -> (i32, i32) {
    %c0_i32 = arith.constant 0 : i32
    %c0_i32_0 = arith.constant 0 : i32
    %c0_i32_1 = arith.constant 0 : i32
    return %c0_i32, %c0_i32_0 : i32, i32
  }
  func.func @transform_9(%arg0: i32) -> (i32, i32) {
    %c0_i32 = arith.constant 0 : i32
    %c0_i32_0 = arith.constant 0 : i32
    %c0_i32_1 = arith.constant 0 : i32
    return %c0_i32, %c0_i32_0 : i32, i32
  }
  func.func @transform_10(%arg0: i32) -> (i32, i32) {
    %c0_i32 = arith.constant 0 : i32
    %c0_i32_0 = arith.constant 0 : i32
    %c0_i32_1 = arith.constant 0 : i32
    return %c0_i32, %c0_i32_0 : i32, i32
  }
  func.func @transform_11(%arg0: i32) -> (i32, i32) {
    %c0_i32 = arith.constant 0 : i32
    %c0_i32_0 = arith.constant 0 : i32
    %c0_i32_1 = arith.constant 0 : i32
    return %c0_i32, %c0_i32_0 : i32, i32
  }
  func.func @transform_12(%arg0: i32) -> (i32, i32, i32) {
    %c0_i32 = arith.constant 0 : i32
    %c0_i32_0 = arith.constant 0 : i32
    %c0_i32_1 = arith.constant 0 : i32
    return %arg0, %c0_i32, %c0_i32_0 : i32, i32, i32
  }
}

</mosaic_0001>

<bundles_post_ra>
// kernel: tpu_custom_call.1
= control target key start
LH: loop header
LB: loop body
LE: loop exit
PB: predicated region body
PF: predicated region fallthrough
CT: control target
= control target key end

     0   :  { %s4418_s0 = inlined_call_operand.hbm [shape: f32[2,8,8], index: 0, kind: input, shape index: {}]   ;;  %s4419_s1 = inlined_call_operand.hbm [shape: f32[2,8,8], index: 1, kind: input, shape index: {}]   ;;  %s4420_s2 = inlined_call_operand.hbm [shape: f32[2,8,128], index: 2, kind: input, shape index: {}]   ;;  %s4421_s3 = inlined_call_operand.hbm [shape: f32[128,256], index: 3, kind: input, shape index: {}]   ;;  %s4422_s4 = inlined_call_operand.hbm [shape: f32[1,256], index: 4, kind: input, shape index: {}]   ;;  %s4423_s5 = inlined_call_operand.vmem [shape: f32[1,128], index: 5, kind: input, shape index: {}]   ;;  %s4424_s6 = inlined_call_operand.vmem [shape: f32[1,128], index: 6, kind: input, shape index: {}]   ;;  %s4425_s7 = inlined_call_operand.hbm [shape: f32[128,384], index: 7, kind: input, shape index: {}]   ;;  %s4426_s8 = inlined_call_operand.hbm [shape: f32[128,384], index: 8, kind: input, shape index: {}]   ;;  %s4427_s9 = inlined_call_operand.vmem [shape: f32[1,384], index: 9, kind: input, shape index: {}]   ;;  %s4428_s10 = inlined_call_operand.hbm [shape: f32[128,384], index: 10, kind: input, shape index: {}]   ;;  %s4429_s11 = inlined_call_operand.vmem [shape: f32[1,384], index: 11, kind: input, shape index: {}]   ;;  %s4430_s12 = inlined_call_operand.hbm [shape: f32[2,8,128], index: 12, kind: output, shape index: {}]  }
   0x1   :  { %4579 = sst [smem:[#allocation152_spill]] %s4419_s1 }
   0x2   :  { %4580 = sst [smem:[#allocation153_spill]] %s4421_s3 }
   0x3   :  { %4581 = sst [smem:[#allocation154_spill]] %s4425_s7 }
   0x4   :  { %4582 = sst [smem:[#allocation155_spill]] %s4427_s9 }
   0x5   :  { %4583 = sst [smem:[#allocation156_spill]] %s4429_s11 }
   0x6   :  { %4584 = sst [smem:[#allocation157_spill]] %s4430_s12 }
   0x7   :  { %17 = vsyncpa [#allocation3], 0 }
   0x8   :  { %19 = vsyncpa [#allocation3 + $0x1], 0 }
   0x9   :  { %20 = vsyncpa [#allocation6], 0 }
   0xa   :  { %22 = vsyncpa [#allocation6 + $0x1], 0 }
   0xb   :  { %23 = vsyncpa [#allocation9], 0 }
   0xc   :  { %24 = vsyncpa [#allocation12], 0 }
   0xd   :  { %25 = vsyncpa [#allocation15], 0 }
   0xe   :  { %26 = vsyncpa [#allocation4], 0 }
   0xf   :  { %28 = vsyncpa [#allocation4 + $0x1], 0  ;;  %s3194_s21 = smov 0   ;;  %s3196_s22 = smov 0  }
  0x10   :  { %s3198_s23 = smov 0   ;;  %s3200_s24 = smov 0  }
  0x11 LB: > { %4585 = sst [smem:[#allocation23_spill]] %s3100_s21  ;;  %s3114_s25 = smov [#allocation8]   ;;  %s3112_s24 = sphi %s3200_s24, %s4874_s24   ;;  %s3108_s23 = sphi %s3198_s23, %s4878_s23   ;;  %s3104_s22 = sphi %s3196_s22, %s4877_s22   ;;  %s3100_s21 = sphi %s3194_s21, %s4876_s21  }
  0x12   : > { %4586 = sst [smem:[#allocation24_spill]] %s3112_s24  ;;  %s344_s26 = sshll.u32 %s3114_s25, 4  ;;  %s345_s26 = int_to_ptr.vmem [resolvable:$true] %s344_s26 }
  0x13   : > { %s3215_s27 = sadd.s32 4294967295, %s3112_s24   ;;  %p2308_p0 = scmp.ge.s32.totalorder %s3112_s24, 1 }
  0x14   : > { %p4431_p1 = scmp.eq.s32.totalorder %s3215_s27, 0  ;;  %p332_p2 = scmp.lt.s32.totalorder %s3112_s24, 3 }
  0x15   : > { %s3115_s29 = smov [#allocation11]   ;;  %s2829_s15 = scalar_lea.vmem %s345_s26, 4096 }
  0x16   : > { %p3220_p3 = pnand %p2308_p0, %p332_p2  ;;  %s374_s30 = sshll.u32 %s3115_s29, 4  ;;  %s375_s30 = int_to_ptr.vmem [resolvable:$true] %s374_s30 }
  0x17   : > { %p2830_p8 = scmp.ne.s32.totalorder %s345_s26, %s2829_s15  ;;  %p2837_p11 = scmp.lt.s32.totalorder %s345_s26, %s345_s26 }
  0x18   : > { %s4587_s28 = scalar_select %p3220_p3, 1, 0 }
  0x19   : > { %p2713_p5 = pneg %p3220_p3  ;;  %p2838_p12 = scmp.lt.s32.totalorder %s2829_s15, %s2829_s15 }
  0x1b   : > { %p3229_p6 = pnand %p2713_p5, %p4431_p1  ;;  %p2839_p13 = por %p2838_p12, %p2837_p11 }
  0x1d   : > { %s4588_s13 = scalar_select %p3229_p6, 1, 0 }
  0x1e   : > { %p3235_p7 = pneg %p3229_p6 }
  0x20   : > { %s4589_s14 = scalar_select %p3235_p7, 1, 0 }
  0x21   : > { %p2832_p9 = pnand %p2830_p8, %p3235_p7 }
  0x23   : > { %p2833_p10 = pneg %p2832_p9 }
  0x25   : > { %p2840_p0 = pnand %p2839_p13, %p2833_p10 }
  0x27   : > { %2843 = shalt.err (!%p2840_p0)
}
  0x28   : > { %s3116_s16 = smov 256   ;;  %s3117_s17 = smov 16  }
  0x29   : > { %s4590_s3 = sld [smem:[#allocation153_spill]]  ;;  %s2855_s20 = scalar_lea.vmem %s375_s30, 6144 }
  0x2a   : > { %p2856_p2 = scmp.ne.s32.totalorder %s375_s30, %s2855_s20  ;;  %p2863_p9 = scmp.lt.s32.totalorder %s375_s30, %s375_s30 }
  0x2b   : > { %p2864_p4 = scmp.lt.s32.totalorder %s2855_s20, %s2855_s20 }
  0x2c   : > { %p2858_p5 = pnand %p2856_p2, %p3235_p7 }
  0x2d   : > { %p2865_p1 = por %p2864_p4, %p2863_p9 }
  0x2e   : > { %p2859_p8 = pneg %p2858_p5 }
  0x2f   : > { %2716 = dma.hbm_to_vmem [thread:$0]  (!%p3229_p6), %s4590_s3, 4096, %s345_s26, [#allocation9], %s3116_s16, %s3116_s16, %s3117_s17  }
  0x30   : > { %p2866_p11 = pnand %p2865_p1, %p2859_p8 }
  0x32   : > { %2869 = shalt.err (!%p2866_p11)
}
  0x33   : > { %s4433_s25 = smov 384   ;;  %s4435_s26 = smov 24  }
  0x34   : > { %s4591_s7 = sld [smem:[#allocation154_spill]]  ;;  %s2307_s16 = sadd.s32 4294967294, %s3112_s24  }
  0x35   : > { %s3258_s17 = sadd.s32 1, %s3112_s24   ;;  %s41_s19 = sadd.s32 1, %s3108_s23 }
  0x36   : > { %4592 = sst [smem:[#allocation25_spill]] %s3258_s17  ;;  %s38_s18 = ssub.s32 %s3112_s24, %s3258_s17 }
  0x37   : > { %p39_p1 = scmp.eq.s32.totalorder %s38_s18, 0  ;;  %p48_p4 = scmp.ne.s32.totalorder %s3108_s23, %s3104_s22 }
  0x38   : > { %p49_p10 = scmp.eq.s32.totalorder %s3112_s24, 0  ;;  %p54_p12 = scmp.ne.s32.totalorder %s3104_s22, %s3100_s21 }
  0x39   : > { %s3269_s20 = scalar_select %p39_p1, %s3108_s23, %s41_s19  }
  0x3a   : > { %2722 = dma.hbm_to_vmem [thread:$0]  (!%p3229_p6), %s4591_s7, 6144, %s375_s30, [#allocation12], %s4433_s25, %s4433_s25, %s4435_s26  }
  0x3b   : > { %4593 = sst [smem:[#allocation26_spill]] %s3269_s20  ;;  %p50_p13 = por %p49_p10, %p48_p4 }
  0x3c   : > { %p4594_p0 = scmp.eq.s32.totalorder %s3215_s27, 0  ;;  %p319_p5 = scmp.eq.s32.totalorder %s3215_s27, 1 }
  0x3d   : > { %p325_p8 = scmp.eq.s32.totalorder %s2307_s16, 1  ;;  %p2748_p9 = scmp.lt.s32.totalorder %s3112_s24, 2 }
  0x3e   : > { %p3273_p2 = por %p4594_p0, %p54_p12  ;;  %s4437_s30 = sand.u32 1, %s3108_s23  }
  0x3f   : > { %p3280_p11 = por %p319_p5, %p48_p4  ;;  %p3284_p3 = por %p325_p8, %p54_p12 }
  0x40   : > { %s4595_s29 = scalar_select %p3273_p2, 1, 0 }
  0x41   : > { %s4596_s15 = scalar_select %p3280_p11, 1, 0 }
  0x42   : > { %s4598_s18 = scalar_select %p3284_p3, 1, 0 }
  0x43   : > { %4597 = sst [smem:[#allocation27_spill]] %s4596_s15  ;;  %s3290_s19 = sshll.u32 %s4437_s30, 3 }
  0x44   : > { %4599 = sst [smem:[#allocation28_spill]] %s4598_s18  ;;  %s3293_s25 = sshll.u32 %s3112_s24, 7 }
  0x45   : > { %p3295_p1 = pnand %p2748_p9, %p50_p13  ;;  %s438_s16 = sand.u32 1, %s3112_s24  }
  0x46   : > { %s4601_s1 = sld [smem:[#allocation152_spill]]  ;;  %s442_s30 = scalar_lea.vmem [#allocation5], %s3290_s19 }
  0x47   : > { %s449_s17 = sshll.u32 %s442_s30, 4  ;;  %s3120_s18 = smov [#allocation10]   ;;  %s3307_s17 = int_to_ptr.vmem [resolvable:$true] %s449_s17 }
  0x48   : > { %s358_s21 = sshll.u32 %s3120_s18, 4  ;;  %s3309_s12 = scalar_lea.sflag [#allocation6], %s438_s16  ;;  %s359_s21 = int_to_ptr.vmem [resolvable:$true] %s358_s21 }
  0x49   : > { %p3315_p10 = pneg %p3295_p1 }
  0x4b   : > { %s4602_s24 = scalar_select %p3315_p10, 1, 0 }
  0x4c   : > { %s3304_s20 = scalar_lea.hbm %s4601_s1, %s3293_s25  ;;  %s2875_s30 = scalar_lea.hbm %s4601_s1, 256 }
  0x4d   : > { %s2870_s15 = scalar_lea.hbm %s3304_s20, 128  ;;  %p2876_p0 = scmp.lt.s32.totalorder %s3304_s20, %s4601_s1 }
  0x4e   : > { %p2871_p4 = scmp.ne.s32.totalorder %s3304_s20, %s2870_s15  ;;  %p2877_p5 = scmp.lt.s32.totalorder %s2875_s30, %s2870_s15 }
  0x50   : > { %p2873_p12 = pnand %p3315_p10, %p2871_p4  ;;  %p2878_p8 = por %p2877_p5, %p2876_p0 }
  0x52   : > { %p2874_p13 = pneg %p2873_p12 }
  0x54   : > { %p2879_p9 = pnand %p2878_p8, %p2874_p13 }
  0x56   : > { %2882 = shalt.err (!%p2879_p9)
}
  0x57   : > { %s2883_s18 = scalar_lea.vmem %s3307_s17, 128  ;;  %s3121_s16 = smov [#allocation5]  }
  0x58   : > { %p2884_p3 = scmp.ne.s32.totalorder %s3307_s17, %s2883_s18  ;;  %s2888_s3 = sshll.u32 %s3121_s16, 4  ;;  %s2889_s3 = int_to_ptr.vmem [resolvable:$false] %s2888_s3 }
  0x59   : > { %s2890_s7 = scalar_lea.vmem %s2889_s3, 256  ;;  %p2891_p11 = scmp.lt.s32.totalorder %s3307_s17, %s2889_s3 }
  0x5a   : > { %p2886_p4 = pnand %p2884_p3, %p3315_p10  ;;  %p2892_p2 = scmp.lt.s32.totalorder %s2890_s7, %s2883_s18 }
  0x5c   : > { %p2887_p12 = pneg %p2886_p4  ;;  %p2893_p6 = por %p2892_p2, %p2891_p11 }
  0x5e   : > { %p2894_p7 = pnand %p2893_p6, %p2887_p12 }
  0x60   : > { %2897 = shalt.err (!%p2894_p7)
}
  0x61   : > { %2735 = dma.hbm_to_vmem [thread:$0]  (!%p3295_p1), %s3304_s20, 128, %s3307_s17, %s3309_s12  }
  0x62   : > { %s2909_s9 = scalar_lea.vmem %s359_s21, 32  ;;  %p4603_p13 = scmp.ne.s32.totalorder %s4589_s14, 0 }
  0x63   : > { %p2910_p3 = scmp.ne.s32.totalorder %s359_s21, %s2909_s9  ;;  %p2917_p8 = scmp.lt.s32.totalorder %s359_s21, %s359_s21 }
  0x64   : > { %p2918_p9 = scmp.lt.s32.totalorder %s2909_s9, %s2909_s9 }
  0x65   : > { %p2912_p0 = pnand %p2910_p3, %p4603_p13 }
  0x66   : > { %p2919_p4 = por %p2918_p9, %p2917_p8 }
  0x67   : > { %p2913_p5 = pneg %p2912_p0 }
  0x69   : > { %p2920_p10 = pnand %p2919_p4, %p2913_p5 }
  0x6b   : > { %2923 = shalt.err (!%p2920_p10)
}
  0x6c   : > { %p4604_p6 = scmp.ne.s32.totalorder %s4588_s13, 0  ;;  %s3122_s30 = smov [#allocation13]  }
  0x6d   : > { %s387_s17 = sshll.u32 %s3122_s30, 4  ;;  %s3123_s20 = smov [#allocation14]   ;;  %s388_s17 = int_to_ptr.vmem [resolvable:$true] %s387_s17 }
  0x6e   : > { %2719 = dma.hbm_to_vmem [thread:$0]  (!%p4604_p6), %s4422_s4, 32, %s359_s21, [#allocation9]  }
  0x6f   : > { %s403_s18 = sshll.u32 %s3123_s20, 4  ;;  %s2935_s16 = scalar_lea.vmem %s388_s17, 6144  ;;  %s404_s18 = int_to_ptr.vmem [resolvable:$true] %s403_s18 }
  0x70   : > { %p2936_p7 = scmp.ne.s32.totalorder %s388_s17, %s2935_s16  ;;  %p2943_p12 = scmp.lt.s32.totalorder %s388_s17, %s388_s17 }
  0x71   : > { %p2944_p3 = scmp.lt.s32.totalorder %s2935_s16, %s2935_s16 }
  0x72   : > { %p2938_p2 = pnand %p2936_p7, %p4603_p13 }
  0x73   : > { %p2945_p10 = por %p2944_p3, %p2943_p12 }
  0x74   : > { %p2939_p11 = pneg %p2938_p2 }
  0x76   : > { %p2946_p0 = pnand %p2945_p10, %p2939_p11 }
  0x78   : > { %2949 = shalt.err (!%p2946_p0)
}
  0x79   : > { %s4605_s3 = smov 24   ;;  %s4606_s7 = smov 384  }
  0x7a   : > { %2725 = dma.hbm_to_vmem [thread:$0]  (!%p4604_p6), %s4426_s8, 6144, %s388_s17, [#allocation12], %s4606_s7, %s4606_s7, %s4605_s3  }
  0x7b   : > { %s2961_s11 = scalar_lea.vmem %s404_s18, 6144  ;;  %p2969_p4 = scmp.lt.s32.totalorder %s404_s18, %s404_s18 }
  0x7c   : > { %p2962_p5 = scmp.ne.s32.totalorder %s404_s18, %s2961_s11  ;;  %p2970_p7 = scmp.lt.s32.totalorder %s2961_s11, %s2961_s11 }
  0x7e   : > { %p2964_p8 = pnand %p2962_p5, %p4603_p13  ;;  %p2971_p2 = por %p2970_p7, %p2969_p4 }
  0x80   : > { %p2965_p9 = pneg %p2964_p8 }
  0x82   : > { %p2972_p11 = pnand %p2971_p2, %p2965_p9 }
  0x84   : > { %2975 = shalt.err (!%p2972_p11)
}
  0x85   : > { %2728 = dma.hbm_to_vmem [thread:$0]  (!%p4604_p6), %s4428_s10, 6144, %s404_s18, [#allocation15], %s4606_s7, %s4606_s7, %s4605_s3  }
  0x86   : > { %s3369_s20 = scalar_lea.hbm %s4418_s0, %s3293_s25  ;;  %s424_s13 = scalar_lea.vmem [#allocation2], %s3290_s19 }
  0x87   : > { %s431_s16 = sshll.u32 %s424_s13, 4  ;;  %s3376_s11 = scalar_lea.hbm %s4420_s2, %s3293_s25  ;;  %s432_s16 = int_to_ptr.vmem [resolvable:$true] %s431_s16 }
  0x88   : > { %s4607_s15 = sand.u32 1, %s3108_s23   ;;  %s2976_s1 = scalar_lea.hbm %s3369_s20, 128 }
  0x89   : > { %s421_s30 = scalar_lea.sflag [#allocation3], %s4607_s15  ;;  %p2977_p13 = scmp.ne.s32.totalorder %s3369_s20, %s2976_s1 }
  0x8a   : > { %p4608_p6 = scmp.ne.s32.totalorder %s4602_s24, 0  ;;  %s2981_s7 = scalar_lea.hbm %s4418_s0, 256 }
  0x8b   : > { %p2982_p10 = scmp.lt.s32.totalorder %s3369_s20, %s4418_s0  ;;  %p2983_p0 = scmp.lt.s32.totalorder %s2981_s7, %s2976_s1 }
  0x8c   : > { %p2979_p12 = pnand %p2977_p13, %p4608_p6 }
  0x8d   : > { %p2984_p5 = por %p2983_p0, %p2982_p10 }
  0x8e   : > { %p2980_p3 = pneg %p2979_p12 }
  0x90   : > { %p2985_p8 = pnand %p2984_p5, %p2980_p3 }
  0x92   : > { %2988 = shalt.err (!%p2985_p8)
}
  0x93   : > { %s2989_s25 = scalar_lea.vmem %s432_s16, 128  ;;  %s3124_s13 = smov [#allocation2]  }
  0x94   : > { %p2990_p9 = scmp.ne.s32.totalorder %s432_s16, %s2989_s25  ;;  %s2994_s21 = sshll.u32 %s3124_s13, 4  ;;  %s2995_s21 = int_to_ptr.vmem [resolvable:$false] %s2994_s21 }
  0x95   : > { %s2996_s9 = scalar_lea.vmem %s2995_s21, 256  ;;  %p2997_p2 = scmp.lt.s32.totalorder %s432_s16, %s2995_s21 }
  0x96   : > { %p2992_p4 = pnand %p2990_p9, %p4608_p6  ;;  %p2998_p11 = scmp.lt.s32.totalorder %s2996_s9, %s2989_s25 }
  0x98   : > { %p2993_p7 = pneg %p2992_p4  ;;  %p2999_p13 = por %p2998_p11, %p2997_p2 }
  0x9a   : > { %p3000_p12 = pnand %p2999_p13, %p2993_p7 }
  0x9c   : > { %3003 = shalt.err (!%p3000_p12)
}
  0x9d   : > { %2732 = dma.hbm_to_vmem [thread:$0]  (!%p3295_p1), %s3369_s20, 128, %s432_s16, %s421_s30  }
  0x9e   : > { %s460_s1 = scalar_lea.vmem [#allocation7], %s3290_s19  ;;  %s3004_s18 = scalar_lea.hbm %s3376_s11, 128 }
  0x9f   : > { %s467_s15 = sshll.u32 %s460_s1, 4  ;;  %p3005_p3 = scmp.ne.s32.totalorder %s3376_s11, %s3004_s18  ;;  %s468_s15 = int_to_ptr.vmem [resolvable:$true] %s467_s15 }
  0xa0   : > { %s3009_s14 = scalar_lea.hbm %s4420_s2, 256  ;;  %p3010_p5 = scmp.lt.s32.totalorder %s3376_s11, %s4420_s2 }
  0xa1   : > { %p3007_p10 = pnand %p3005_p3, %p4608_p6  ;;  %p3011_p8 = scmp.lt.s32.totalorder %s3009_s14, %s3004_s18 }
  0xa3   : > { %p3008_p0 = pneg %p3007_p10  ;;  %p3012_p9 = por %p3011_p8, %p3010_p5 }
  0xa5   : > { %p3013_p4 = pnand %p3012_p9, %p3008_p0 }
  0xa7   : > { %3016 = shalt.err (!%p3013_p4)
}
  0xa8   : > { %s3017_s19 = scalar_lea.vmem %s468_s15, 128  ;;  %s3125_s20 = smov [#allocation7]  }
  0xa9   : > { %p3018_p7 = scmp.ne.s32.totalorder %s468_s15, %s3017_s19  ;;  %s3022_s16 = sshll.u32 %s3125_s20, 4  ;;  %s3023_s16 = int_to_ptr.vmem [resolvable:$false] %s3022_s16 }
  0xaa   : > { %s3024_s30 = scalar_lea.vmem %s3023_s16, 256  ;;  %p3025_p13 = scmp.lt.s32.totalorder %s468_s15, %s3023_s16 }
  0xab   : > { %p3020_p2 = pnand %p3018_p7, %p4608_p6  ;;  %p3026_p12 = scmp.lt.s32.totalorder %s3024_s30, %s3017_s19 }
  0xad   : > { %p3021_p11 = pneg %p3020_p2  ;;  %p3027_p3 = por %p3026_p12, %p3025_p13 }
  0xaf   : > { %p3028_p10 = pnand %p3027_p3, %p3021_p11 }
  0xb1   : > { %3031 = shalt.err (!%p3028_p10)
}
  0xb2   : > { %2738 = dma.hbm_to_vmem [thread:$0]  (!%p3295_p1), %s3376_s11, 128, %s468_s15, %s3309_s12  }
  0xb3   : > { %p4609_p0 = scmp.ne.s32.totalorder %s4587_s28, 0 }
  0xb5   : > { %476 = sbr.rel (%p4609_p0) target bundleno = 1678 (0x68e), region = 68 }
  0xba   : > { %s3417_s24 = sand.u32 1, %s3104_s22   ;;  %p4610_p6 = scmp.ne.s32.totalorder %s4595_s29, 0 }
  0xbb   : > { %s3420_s13 = sshll.u32 %s3417_s24, 3  ;;  %s479_s21 = scalar_lea.sflag [#allocation3], %s3417_s24 }
  0xbc   : > { %s482_s9 = scalar_lea.vmem [#allocation2], %s3420_s13 }
  0xbd   : > { %3075 = dma.done.wait (%p4610_p6), %s479_s21, 128  }
  0xbe   : > { %3077 = vsyncadd (%p4610_p6), %s479_s21, 4294967168  ;;  %s487_s12 = sand.u32 1, %s3215_s27   ;;  %s491_s26 = scalar_lea.vmem [#allocation5], %s3420_s13 }
  0xbf   : > { %s488_s28 = scalar_lea.sflag [#allocation6], %s487_s12 }
  0xc0   : > { %3079 = dma.done.wait (%p4610_p6), %s488_s28, 256  }
  0xc1   : > { %3081 = vsyncadd (%p4610_p6), %s488_s28, 4294967040  ;;  %s500_s11 = scalar_lea.vmem [#allocation7], %s3420_s13  ;;  %p4611_p1 = scmp.eq.s32.totalorder %s3215_s27, 0 }
  0xc3   : > { %3083 = dma.done.wait (%p4611_p1), [#allocation9], 4128   ;;  %p4612_p5 = pmov %p4611_p1 }
  0xc4   : > { %p4613_p8 = pmov %p4611_p1 }
  0xc5   : > { %3085 = vsyncadd (%p4612_p5), [#allocation9], 4294963168 }
  0xc6   : > { %3087 = dma.done.wait (%p4613_p8), [#allocation12], 12288   ;;  %p4614_p9 = pmov %p4611_p1 }
  0xc7   : > { %p4615_p4 = pmov %p4611_p1 }
  0xc8   : > { %3089 = vsyncadd (%p4614_p9), [#allocation12], 4294955008 }
  0xc9   : > { %3091 = dma.done.wait (%p4615_p4), [#allocation15], 6144   ;;  %p4616_p7 = pmov %p4611_p1 }
  0xca   : > { %v4454_v0 = vmov 0.0   ;;  %v3449_v1 = vld [vmem:[#allocation8 + $0xf8] sm:$0xff]  ;;  %v3451_v2 = vld [vmem:[#allocation8 + $0xf0] sm:$0xff]  ;;  %v3453_v3 = vld [vmem:[#allocation8 + $0xe8] sm:$0xff]  ;;  %vm3127_vm0 = vmmov 0   ;;  %v606_v47 = vlaneseq  ;;  %vm695_vm1 = vcmask 64512  }
  0xcb   : > { %3093 = vsyncadd (%p4616_p7), [#allocation15], 4294961152  ;;  %680 = vmatprep.mubr.f32.mxu0 %v4454_v0  ;;  %2455 = vmatprep.subr.mxu1 %v4454_v0  ;;  %v3456_v4 = vld [vmem:[#allocation8 + $0xe0] sm:$0xff]  ;;  %v3459_v5 = vld [vmem:[#allocation8 + $0xd8] sm:$0xff]  ;;  %s4741_s14 = sld [smem:[#allocation155_spill]]  ;;  %s2342_s16 = sshll.u32 %s3215_s27, 7 }
  0xcc   : > { %616 = vmatprep.subr.mxu0 %v3449_v1  ;;  %v3462_v6 = vld [vmem:[#allocation8 + $0xd0] sm:$0xff]  ;;  %v3465_v7 = vld [vmem:[#allocation8 + $0xc8] sm:$0xff]  ;;  %v3468_v8 = vld [vmem:[#allocation8 + $0xc0] sm:$0xff]  ;;  %2457 = vmatprep.mubr.msk.f32.mxu1 %vm3127_vm0, %v4454_v0  ;;  %v3607_v48 = vshrl.u32 %v606_v47, 7  ;;  %s4742_s19 = sld [smem:[#allocation156_spill]]  ;;  %s570_s30 = scalar_lea.vmem [#allocation16], %s3420_s13 }
  0xcd   : > { %617 = vmatpush1.msra.mxu0 %v3451_v2  ;;  %v3471_v9 = vld [vmem:[#allocation8 + $0xb8] sm:$0xff]  ;;  %v3474_v10 = vld [vmem:[#allocation8 + $0xb0] sm:$0xff]  ;;  %v3477_v11 = vld [vmem:[#allocation8 + $0xa8] sm:$0xff]  ;;  %s4866_s20 = sld [smem:[#allocation27_spill]]  ;;  %s2146_s21 = sshll.u32 %s570_s30, 4  ;;  %s2147_s21 = int_to_ptr.vmem [resolvable:$true] %s2146_s21 }
  0xce   : > { %618 = vmatprep.subr.mxu0 %v3453_v3  ;;  %v3480_v12 = vld [vmem:[#allocation8 + $0xa0] sm:$0xff]  ;;  %v3483_v13 = vld [vmem:[#allocation8 + $0x98] sm:$0xff]  ;;  %v3486_v14 = vld [vmem:[#allocation8 + $0x90] sm:$0xff]  ;;  %v3610_v49 = vsub.s32 0, %v3607_v48  ;;  %v3613_v51 = vsub.s32 1, %v3607_v48  ;;  %s4867_s28 = sld [smem:[#allocation157_spill]] }
  0xcf   : > { %619 = vmatpush1.msra.mxu0 %v3456_v4  ;;  %v3489_v15 = vld [vmem:[#allocation8 + $0x88] sm:$0xff]  ;;  %v3492_v16 = vld [vmem:[#allocation8 + $0x80] sm:$0xff]  ;;  %v3495_v17 = vld [vmem:[#allocation8 + $0x78] sm:$0xff]  ;;  %s3032_s29 = scalar_lea.vmem %s2147_s21, 128  ;;  %s3128_s1 = smov [#allocation16]  }
  0xd0   : > { %620 = vmatprep.subr.mxu0 %v3459_v5  ;;  %v3498_v18 = vld [vmem:[#allocation8 + $0x70] sm:$0xff]  ;;  %v3501_v19 = vld [vmem:[#allocation8 + $0x68] sm:$0xff]  ;;  %v3504_v20 = vld [vmem:[#allocation8 + $0x60] sm:$0xff]  ;;  %p3033_p2 = scmp.ne.s32.totalorder %s2147_s21, %s3032_s29  ;;  %s3036_s15 = sshll.u32 %s3128_s1, 4  ;;  %s3037_s15 = int_to_ptr.vmem [resolvable:$false] %s3036_s15 }
  0xd1   : > { %621 = vmatpush1.msra.mxu0 %v3462_v6  ;;  %v3507_v21 = vld [vmem:[#allocation8 + $0x58] sm:$0xff]  ;;  %v3510_v22 = vld [vmem:[#allocation8 + $0x50] sm:$0xff]  ;;  %v3513_v23 = vld [vmem:[#allocation8 + $0x48] sm:$0xff]  ;;  %s3038_s27 = scalar_lea.vmem %s3037_s15, 256  ;;  %p3039_p3 = scmp.lt.s32.totalorder %s2147_s21, %s3037_s15 }
  0xd2   : > { %622 = vmatprep.subr.mxu0 %v3465_v7  ;;  %v3516_v24 = vld [vmem:[#allocation8 + $0x40] sm:$0xff]  ;;  %v3519_v25 = vld [vmem:[#allocation8 + $0x38] sm:$0xff]  ;;  %v3522_v26 = vld [vmem:[#allocation8 + $0x30] sm:$0xff]  ;;  %p3040_p10 = scmp.lt.s32.totalorder %s3038_s27, %s3032_s29 }
  0xd3   : > { %623 = vmatpush1.msra.mxu0 %v3468_v8  ;;  %v3525_v27 = vld [vmem:[#allocation8 + $0x28] sm:$0xff]  ;;  %v3528_v28 = vld [vmem:[#allocation8 + $0x20] sm:$0xff]  ;;  %v3531_v29 = vld [vmem:[#allocation8 + $0x18] sm:$0xff]  ;;  %p4868_p11 = scmp.ne.s32.totalorder %s4866_s20, 0 }
  0xd4   : > { %624 = vmatprep.subr.mxu0 %v3471_v9  ;;  %v3534_v30 = vld [vmem:[#allocation8 + $0x10] sm:$0xff]  ;;  %v3537_v31 = vld [vmem:[#allocation8 + $0x8] sm:$0xff]  ;;  %v3540_v32 = vld [vmem:[#allocation8] sm:$0xff]  ;;  %p3041_p0 = por %p3040_p10, %p3039_p3 }
  0xd5   : > { %625 = vmatpush1.msra.mxu0 %v3474_v10  ;;  %v3545_v33 = vld [vmem:[%s500_s11] sm:$0xff]  ;;  %v3559_v35 = vld [vmem:[#allocation13 + $0x160] sm:$0xff]  ;;  %v604_v50 = vld [vmem:[#allocation10] sm:$0x3]  ;;  %s2133_s11 = scalar_lea.sflag [#allocation4], %s3417_s24  ;;  %p3034_p13 = pnand %p3033_p2, %p4868_p11 }
  0xd6   : > { %626 = vmatprep.subr.mxu0 %v3477_v11  ;;  %v3555_v34 = vld [vmem:[#allocation13 + $0x178] sm:$0xff]  ;;  %4618 = vst [vmem:[#allocation30_spill] sm:$0xff] %v3559_v35  ;;  %v3563_v36 = vld [vmem:[#allocation13 + $0x148] sm:$0xff]  ;;  %v3567_v37 = vld [vmem:[#allocation13 + $0x130] sm:$0xff]  ;;  %v3616_v52 = vrot.slane %v604_v50, %v3610_v49  ;;  %v3619_v53 = vrot.slane %v604_v50, %v3613_v51 }
  0xd7   : > { %627 = vmatpush1.msra.mxu0 %v3480_v12  ;;  %4617 = vst [vmem:[#allocation29_spill] sm:$0xff] %v3555_v34  ;;  %4619 = vst [vmem:[#allocation31_spill] sm:$0xff] %v3563_v36  ;;  %v3571_v38 = vld [vmem:[#allocation13 + $0x118] sm:$0xff]  ;;  %v3575_v39 = vld [vmem:[#allocation13 + $0x100] sm:$0xff]  ;;  %p3035_p12 = pneg %p3034_p13 }
  0xd8   : > { %628 = vmatprep.subr.mxu0 %v3483_v13  ;;  %4620 = vst [vmem:[#allocation32_spill] sm:$0xff] %v3567_v37  ;;  %4621 = vst [vmem:[#allocation33_spill] sm:$0xff] %v3571_v38  ;;  %v3579_v40 = vld [vmem:[#allocation13 + $0xe8] sm:$0xff]  ;;  %v3583_v41 = vld [vmem:[#allocation13 + $0xd0] sm:$0xff] }
  0xd9   : > { %629 = vmatpush1.msra.mxu0 %v3486_v14  ;;  %4622 = vst [vmem:[#allocation34_spill] sm:$0xff] %v3575_v39  ;;  %4623 = vst [vmem:[#allocation35_spill] sm:$0xff] %v3579_v40  ;;  %v3587_v42 = vld [vmem:[#allocation13 + $0xb8] sm:$0xff]  ;;  %v3591_v43 = vld [vmem:[#allocation13 + $0xa0] sm:$0xff]  ;;  %p3042_p6 = pnand %p3041_p0, %p3035_p12 }
  0xda   : > { %630 = vmatprep.subr.mxu0 %v3489_v15  ;;  %4624 = vst [vmem:[#allocation36_spill] sm:$0xff] %v3583_v41  ;;  %4625 = vst [vmem:[#allocation37_spill] sm:$0xff] %v3587_v42  ;;  %v3595_v44 = vld [vmem:[#allocation13 + $0x88] sm:$0xff]  ;;  %v3599_v45 = vld [vmem:[#allocation13 + $0x70] sm:$0xff] }
  0xdb   : > { %631 = vmatpush1.msra.mxu0 %v3492_v16  ;;  %4626 = vst [vmem:[#allocation38_spill] sm:$0xff] %v3591_v43  ;;  %4627 = vst [vmem:[#allocation39_spill] sm:$0xff] %v3595_v44  ;;  %v3603_v46 = vld [vmem:[#allocation13 + $0x58] sm:$0xff]  ;;  %v3627_v59 = vld [vmem:[#allocation13 + $0x170] sm:$0xff] }
  0xdc   : > { %632 = vmatprep.subr.mxu0 %v3495_v17  ;;  %4628 = vst [vmem:[#allocation40_spill] sm:$0xff] %v3599_v45  ;;  %4629 = vst [vmem:[#allocation41_spill] sm:$0xff] %v3603_v46  ;;  %v3624_v56 = vld [vmem:[%s482_s9] sm:$0xff]  ;;  %v3636_v60 = vld [vmem:[%s491_s26] sm:$0xff]  ;;  %s2144_s26 = scalar_lea.hbm %s4867_s28, %s2342_s16 }
  0xdd   : > { %633 = vmatpush1.msra.mxu0 %v3498_v18  ;;  %4630 = vst [vmem:[#allocation42_spill] sm:$0xff] %v3616_v52  ;;  %4631 = vst [vmem:[#allocation43_spill] sm:$0xff] %v3619_v53  ;;  %v3639_v61 = vld [vmem:[#allocation13 + $0x168] sm:$0xff]  ;;  %v3641_v62 = vld [vmem:[#allocation13 + $0x158] sm:$0xff] }
  0xde   : > { %634 = vmatprep.subr.mxu0 %v3501_v19  ;;  %4632 = vst [vmem:[#allocation44_spill] sm:$0xff] %v3624_v56  ;;  %4633 = vst [vmem:[#allocation45_spill] sm:$0xff] %v3636_v60  ;;  %v3645_v63 = vld [vmem:[#allocation13 + $0x150] sm:$0xff]  ;;  %v3648_v47 = vld [vmem:[#allocation13 + $0x140] sm:$0xff] }
  0xdf   : > { %635 = vmatpush1.msra.mxu0 %v3504_v20  ;;  %v3652_v50 = vld [vmem:[#allocation13 + $0x138] sm:$0xff] }
  0xe0   : > { %636 = vmatprep.subr.mxu0 %v3507_v21 }
  0xe1   : > { %637 = vmatpush1.msra.mxu0 %v3510_v22 }
  0xe2   : > { %638 = vmatprep.subr.mxu0 %v3513_v23 }
  0xe3   : > { %639 = vmatpush1.msra.mxu0 %v3516_v24 }
  0xe4   : > { %640 = vmatprep.subr.mxu0 %v3519_v25 }
  0xe5   : > { %641 = vmatpush1.msra.mxu0 %v3522_v26 }
  0xe6   : > { %642 = vmatprep.subr.mxu0 %v3525_v27 }
  0xe7   : > { %643 = vmatpush1.msra.mxu0 %v3528_v28 }
  0xe8   : > { %644 = vmatprep.subr.mxu0 %v3531_v29 }
  0xe9   : > { %645 = vmatpush1.msra.mxu0 %v3534_v30 }
  0xea   : > { %646 = vmatprep.subr.mxu0 %v3537_v31 }
  0xeb   : > { %647 = vmatpush1.msra.mxu0 %v3540_v32 }
  0xec   : > { %681 = vmatmul.mubr.f32.vlgmr.msra.gmra.mxu0 %v3545_v33  ;;  %2465 = vmatprep.subr.mxu0 %v4454_v0 }
  0xed   : > { %2497 = vmatprep.mubr.msk.f32.mxu0 %vm3127_vm0, %v4454_v0  ;;  %2466 = vmatpush3.msra.mxu0 %v3555_v34  ;;  %v3706_v34 = vld [vmem:[#allocation13 + $0x60] sm:$0xff] }
  0xee   : > { %2467 = vmatprep.subr.mxu0 %v4454_v0  ;;  %4641 = vst [vmem:[#allocation53_spill] sm:$0xff] %v3706_v34 }
  0xef   : > { %2468 = vmatpush3.msra.mxu0 %v3559_v35  ;;  %v3703_v35 = vld [vmem:[#allocation13 + $0x68] sm:$0xff] }
  0xf0   : > { %2469 = vmatprep.subr.mxu0 %v4454_v0  ;;  %4640 = vst [vmem:[#allocation52_spill] sm:$0xff] %v3703_v35 }
  0xf1   : > { %2470 = vmatpush3.msra.mxu0 %v3563_v36  ;;  %v3700_v36 = vld [vmem:[#allocation13 + $0x78] sm:$0xff] }
  0xf2   : > { %2471 = vmatprep.subr.mxu0 %v4454_v0  ;;  %4639 = vst [vmem:[#allocation51_spill] sm:$0xff] %v3700_v36 }
  0xf3   : > { %2472 = vmatpush3.msra.mxu0 %v3567_v37  ;;  %v3697_v37 = vld [vmem:[#allocation13 + $0x80] sm:$0xff] }
  0xf4   : > { %2473 = vmatprep.subr.mxu0 %v4454_v0  ;;  %4638 = vst [vmem:[#allocation50_spill] sm:$0xff] %v3697_v37 }
  0xf5   : > { %2474 = vmatpush3.msra.mxu0 %v3571_v38  ;;  %v3694_v38 = vld [vmem:[#allocation13 + $0x90] sm:$0xff] }
  0xf6   : > { %2475 = vmatprep.subr.mxu0 %v4454_v0  ;;  %4637 = vst [vmem:[#allocation49_spill] sm:$0xff] %v3694_v38 }
  0xf7   : > { %2476 = vmatpush3.msra.mxu0 %v3575_v39  ;;  %v3691_v39 = vld [vmem:[#allocation13 + $0x98] sm:$0xff] }
  0xf8   : > { %2477 = vmatprep.subr.mxu0 %v4454_v0  ;;  %4636 = vst [vmem:[#allocation48_spill] sm:$0xff] %v3691_v39 }
  0xf9   : > { %2478 = vmatpush3.msra.mxu0 %v3579_v40  ;;  %v3688_v40 = vld [vmem:[#allocation13 + $0xa8] sm:$0xff] }
  0xfa   : > { %2479 = vmatprep.subr.mxu0 %v4454_v0  ;;  %4635 = vst [vmem:[#allocation47_spill] sm:$0xff] %v3688_v40 }
  0xfb   : > { %2480 = vmatpush3.msra.mxu0 %v3583_v41  ;;  %v3685_v41 = vld [vmem:[#allocation13 + $0xb0] sm:$0xff] }
  0xfc   : > { %2481 = vmatprep.subr.mxu0 %v4454_v0  ;;  %4634 = vst [vmem:[#allocation46_spill] sm:$0xff] %v3685_v41 }
  0xfd   : > { %2482 = vmatpush3.msra.mxu0 %v3587_v42  ;;  %v3682_v42 = vld [vmem:[#allocation13 + $0xc0] sm:$0xff] }
  0xfe   : > { %2483 = vmatprep.subr.mxu0 %v4454_v0 }
  0xff   : > { %2484 = vmatpush3.msra.mxu0 %v3591_v43  ;;  %v3679_v43 = vld [vmem:[#allocation13 + $0xc8] sm:$0xff] }
 0x100   : > { %2485 = vmatprep.subr.mxu0 %v4454_v0 }
 0x101   : > { %2486 = vmatpush3.msra.mxu0 %v3595_v44  ;;  %v3676_v44 = vld [vmem:[#allocation13 + $0xd8] sm:$0xff] }
 0x102   : > { %2487 = vmatprep.subr.mxu0 %v4454_v0 }
 0x103   : > { %2488 = vmatpush3.msra.mxu0 %v3599_v45  ;;  %v3673_v45 = vld [vmem:[#allocation13 + $0xe0] sm:$0xff] }
 0x104   : > { %2489 = vmatprep.subr.mxu0 %v4454_v0 }
 0x105   : > { %2490 = vmatpush3.msra.mxu0 %v3603_v46  ;;  %v3670_v46 = vld [vmem:[#allocation13 + $0xf0] sm:$0xff] }
 0x106   : > { %2491 = vmatprep.subr.mxu0 %v4454_v0 }
 0x1ac   : > { %v682_v54 = vpop.f32.mrf.mxu0 }
 0x1ad   : > { %v683_v55 = vadd.f32 %v682_v54, %v3616_v52  ;;  %v3655_v54 = vld [vmem:[#allocation13 + $0x128] sm:$0xff]  ;;  %v3720_v52 = vld [vmem:[#allocation13 + $0x30] sm:$0xff] }
 0x1ae   : > { %v684_v57 = vpop.f32.mrf.mxu0  ;;  %4645 = vst [vmem:[#allocation57_spill] sm:$0xff] %v3720_v52 }
 0x1af   : > { %v685_v58 = vadd.f32 %v684_v57, %v3619_v53  ;;  %2456 = vmatpush3.msra.mxu1 %v683_v55  ;;  %v3658_v55 = vld [vmem:[#allocation13 + $0x120] sm:$0xff]  ;;  %v3661_v57 = vld [vmem:[#allocation13 + $0x110] sm:$0xff]  ;;  %v3717_v53 = vld [vmem:[#allocation13 + $0x38] sm:$0xff] }
 0x1b0   : > { %2458 = vmatmul.mubr.msk.f32.vlgmr.msra.gmra.mxu1 %vm695_vm1, %v3624_v56  ;;  %2460 = vmatprep.subr.mxu1 %v4454_v0  ;;  %v3712_v56 = vld [vmem:[#allocation13 + $0x48] sm:$0xff]  ;;  %4644 = vst [vmem:[#allocation56_spill] sm:$0xff] %v3717_v53 }
 0x1b1   : > { %2461 = vmatpush3.msra.mxu1 %v685_v58  ;;  %2462 = vmatprep.mubr.msk.f32.mxu1 %vm3127_vm0, %v4454_v0  ;;  %v3664_v58 = vld [vmem:[#allocation13 + $0x108] sm:$0xff]  ;;  %4643 = vst [vmem:[#allocation55_spill] sm:$0xff] %v3712_v56 }
 0x1b2   : > { %946 = vmatprep.subr.mxu1 %v3627_v59 }
 0x1b4   : > { %2463 = vmatmul.mubr.msk.f32.vlgmr.msra.gmra.mxu1 %vm695_vm1, %v3636_v60  ;;  %v3709_v60 = vld [vmem:[#allocation13 + $0x50] sm:$0xff] }
 0x1b5   : > { %947 = vmatpush1.msra.mxu1 %v3639_v61  ;;  %1010 = vmatprep.mubr.f32.mxu1 %v4454_v0  ;;  %v3667_v0 = vld [vmem:[#allocation13 + $0xf8] sm:$0xff]  ;;  %4642 = vst [vmem:[#allocation54_spill] sm:$0xff] %v3709_v60 }
 0x1b6   : > { %948 = vmatprep.subr.mxu1 %v3641_v62 }
 0x1b7   : > { %949 = vmatpush1.msra.mxu1 %v3645_v63 }
 0x1b8   : > { %950 = vmatprep.subr.mxu1 %v3648_v47 }
 0x1b9   : > { %951 = vmatpush1.msra.mxu1 %v3652_v50 }
 0x1ba   : > { %952 = vmatprep.subr.mxu1 %v3655_v54 }
 0x1bb   : > { %953 = vmatpush1.msra.mxu1 %v3658_v55 }
 0x1bc   : > { %954 = vmatprep.subr.mxu1 %v3661_v57 }
 0x1bd   : > { %955 = vmatpush1.msra.mxu1 %v3664_v58 }
 0x1be   : > { %956 = vmatprep.subr.mxu1 %v3667_v0 }
 0x1bf   : > { %957 = vmatpush1.msra.mxu1 %v3670_v46 }
 0x1c0   : > { %958 = vmatprep.subr.mxu1 %v3673_v45 }
 0x1c1   : > { %959 = vmatpush1.msra.mxu1 %v3676_v44 }
 0x1c2   : > { %960 = vmatprep.subr.mxu1 %v3679_v43 }
 0x1c3   : > { %961 = vmatpush1.msra.mxu1 %v3682_v42 }
 0x1c4   : > { %962 = vmatprep.subr.mxu1 %v3685_v41  ;;  %v3770_v41 = vld [vmem:[#allocation11 + $0x140] sm:$0xff] }
 0x1c5   : > { %963 = vmatpush1.msra.mxu1 %v3688_v40  ;;  %v3762_v40 = vld [vmem:[#allocation11 + $0x158] sm:$0xff]  ;;  %4660 = vst [vmem:[#allocation71_spill] sm:$0xff] %v3770_v41 }
 0x1c6   : > { %964 = vmatprep.subr.mxu1 %v3691_v39  ;;  %4657 = vst [vmem:[#allocation68_spill] sm:$0xff] %v3762_v40 }
 0x1c7   : > { %965 = vmatpush1.msra.mxu1 %v3694_v38 }
 0x1c8   : > { %966 = vmatprep.subr.mxu1 %v3697_v37  ;;  %v3722_v37 = vld [vmem:[#allocation13 + $0x40] sm:$0xff] }
 0x1c9   : > { %967 = vmatpush1.msra.mxu1 %v3700_v36  ;;  %4646 = vst [vmem:[#allocation58_spill] sm:$0xff] %v3722_v37  ;;  %2492 = vmatpush3.msra.mxu0 %v3722_v37  ;;  %v3740_v37 = vld [vmem:[#allocation13] sm:$0xff] }
 0x1ca   : > { %968 = vmatprep.subr.mxu1 %v3703_v35  ;;  %v3726_v35 = vld [vmem:[#allocation13 + $0x20] sm:$0xff]  ;;  %4652 = vst [vmem:[#allocation63_spill] sm:$0xff] %v3740_v37 }
 0x1cb   : > { %969 = vmatpush1.msra.mxu1 %v3706_v34  ;;  %4647 = vst [vmem:[#allocation59_spill] sm:$0xff] %v3726_v35  ;;  %v4648_v34 = vmov 0.0  }
 0x1cc   : > { %970 = vmatprep.subr.mxu1 %v3709_v60  ;;  %2493 = vmatprep.subr.mxu0 %v4648_v34  ;;  %v3730_v60 = vld [vmem:[#allocation13 + $0x18] sm:$0xff] }
 0x1cd   : > { %971 = vmatpush1.msra.mxu1 %v3712_v56  ;;  %4649 = vst [vmem:[#allocation60_spill] sm:$0xff] %v3730_v60  ;;  %v3732_v56 = vld [vmem:[#allocation13 + $0x28] sm:$0xff] }
 0x1ce   : > { %972 = vmatprep.subr.mxu1 %v3717_v53  ;;  %4650 = vst [vmem:[#allocation61_spill] sm:$0xff] %v3732_v56  ;;  %2494 = vmatpush3.msra.mxu0 %v3732_v56  ;;  %v3736_v53 = vld [vmem:[#allocation13 + $0x8] sm:$0xff] }
 0x1cf   : > { %973 = vmatpush1.msra.mxu1 %v3720_v52  ;;  %4651 = vst [vmem:[#allocation62_spill] sm:$0xff] %v3736_v53  ;;  %2495 = vmatprep.subr.mxu0 %v4648_v34  ;;  %v3742_v52 = vld [vmem:[#allocation13 + $0x10] sm:$0xff] }
 0x1d0   : > { %974 = vmatprep.subr.mxu1 %v3726_v35  ;;  %4653 = vst [vmem:[#allocation64_spill] sm:$0xff] %v3742_v52  ;;  %2496 = vmatpush3.msra.mxu0 %v3742_v52  ;;  %v3746_v35 = vld [vmem:[#allocation11 + $0x170] sm:$0xff]  ;;  %v3760_v52 = vld [vmem:[#allocation11 + $0x178] sm:$0xff] }
 0x1d1   : > { %975 = vmatpush1.msra.mxu1 %v3730_v60  ;;  %4654 = vst [vmem:[#allocation65_spill] sm:$0xff] %v3746_v35  ;;  %2500 = vmatprep.subr.mxu0 %v4648_v34  ;;  %4656 = vst [vmem:[#allocation67_spill] sm:$0xff] %v3760_v52 }
 0x1d2   : > { %976 = vmatprep.subr.mxu1 %v3736_v53  ;;  %v3755_v53 = vld [vmem:[%s4424_s6] ss:$0 sm:$0xff] }
 0x1d3   : > { %977 = vmatpush1.msra.mxu1 %v3740_v37  ;;  %v3758_v37 = vld [vmem:[#allocation11 + $0x168] sm:$0xff] }
 0x1d4   : > { %1087 = vmatprep.subr.mxu1 %v3746_v35  ;;  %4655 = vst [vmem:[#allocation66_spill] sm:$0xff] %v3758_v37  ;;  %v3764_v35 = vld [vmem:[#allocation11 + $0x150] sm:$0xff] }
 0x1d5   : > { %4658 = vst [vmem:[#allocation69_spill] sm:$0xff] %v3764_v35 }
 0x270   : > { %v3750_v56 = vpop.f32.mrf.mxu1 }
 0x272   : > { %v2459_v60 = vpop.f32.mrf.mxu1 }
 0x273   : > { %v3766_v60 = vld [vmem:[#allocation11 + $0x160] sm:$0xff] }
 0x274   : > { %v846_v36 = vpop.f32.mrf.mxu1  ;;  %4659 = vst [vmem:[#allocation70_spill] sm:$0xff] %v3766_v60 }
 0x275   : > { %v847_v38 = vadd.f32 %v3755_v53, %v846_v36  ;;  %v3774_v36 = vld [vmem:[#allocation11 + $0x138] sm:$0xff] }
 0x276   : > { %v2464_v39 = vpop.f32.mrf.mxu1  ;;  %4661 = vst [vmem:[#allocation72_spill] sm:$0xff] %v3774_v36 }
 0x277   : > { %1011 = vmatmul.mubr.f32.vlgmr.msra.gmra.mxu1 %v847_v38  ;;  %2498 = vmatmul.mubr.f32.vlgmr.msra.gmra.mxu0 %v847_v38  ;;  %v3776_v39 = vld [vmem:[#allocation11 + $0x148] sm:$0xff] }
 0x278   : > { %1088 = vmatpush1.msra.mxu1 %v3758_v37  ;;  %2501 = vmatpush3.msra.mxu0 %v3760_v52  ;;  %4662 = vst [vmem:[#allocation73_spill] sm:$0xff] %v3776_v39  ;;  %v3780_v38 = vld [vmem:[#allocation11 + $0x128] sm:$0xff]  ;;  %v3784_v52 = vld [vmem:[#allocation11 + $0x120] sm:$0xff]  ;;  %v3786_v37 = vld [vmem:[#allocation11 + $0x130] sm:$0xff] }
 0x279   : > { %1089 = vmatprep.subr.mxu1 %v3762_v40  ;;  %2502 = vmatprep.subr.mxu0 %v4648_v34  ;;  %4663 = vst [vmem:[#allocation74_spill] sm:$0xff] %v3780_v38  ;;  %4664 = vst [vmem:[#allocation75_spill] sm:$0xff] %v3784_v52  ;;  %v3790_v40 = vld [vmem:[#allocation11 + $0x110] sm:$0xff] }
 0x27a   : > { %1090 = vmatpush1.msra.mxu1 %v3764_v35  ;;  %2503 = vmatpush3.msra.mxu0 %v3766_v60  ;;  %4665 = vst [vmem:[#allocation76_spill] sm:$0xff] %v3786_v37  ;;  %4666 = vst [vmem:[#allocation77_spill] sm:$0xff] %v3790_v40  ;;  %v3794_v60 = vld [vmem:[#allocation11 + $0x108] sm:$0xff]  ;;  %v3796_v35 = vld [vmem:[#allocation11 + $0x118] sm:$0xff] }
 0x27b   : > { %1091 = vmatprep.subr.mxu1 %v3770_v41  ;;  %2504 = vmatprep.subr.mxu0 %v4648_v34  ;;  %4667 = vst [vmem:[#allocation78_spill] sm:$0xff] %v3794_v60  ;;  %4668 = vst [vmem:[#allocation79_spill] sm:$0xff] %v3796_v35  ;;  %v3800_v41 = vld [vmem:[#allocation11 + $0xf8] sm:$0xff] }
 0x27c   : > { %1092 = vmatpush1.msra.mxu1 %v3774_v36  ;;  %2505 = vmatpush3.msra.mxu0 %v3776_v39  ;;  %4669 = vst [vmem:[#allocation80_spill] sm:$0xff] %v3800_v41  ;;  %v3804_v39 = vld [vmem:[#allocation11 + $0xf0] sm:$0xff]  ;;  %v3806_v36 = vld [vmem:[#allocation11 + $0x100] sm:$0xff] }
 0x27d   : > { %1093 = vmatprep.subr.mxu1 %v3780_v38  ;;  %2506 = vmatprep.subr.mxu0 %v4648_v34  ;;  %4670 = vst [vmem:[#allocation81_spill] sm:$0xff] %v3804_v39  ;;  %4671 = vst [vmem:[#allocation82_spill] sm:$0xff] %v3806_v36  ;;  %v3810_v38 = vld [vmem:[#allocation11 + $0xe0] sm:$0xff] }
 0x27e   : > { %1094 = vmatpush1.msra.mxu1 %v3784_v52  ;;  %2507 = vmatpush3.msra.mxu0 %v3786_v37  ;;  %4672 = vst [vmem:[#allocation83_spill] sm:$0xff] %v3810_v38  ;;  %v3814_v37 = vld [vmem:[#allocation11 + $0xd8] sm:$0xff]  ;;  %v3816_v52 = vld [vmem:[#allocation11 + $0xe8] sm:$0xff] }
 0x27f   : > { %1095 = vmatprep.subr.mxu1 %v3790_v40  ;;  %2508 = vmatprep.subr.mxu0 %v4648_v34  ;;  %4673 = vst [vmem:[#allocation84_spill] sm:$0xff] %v3814_v37  ;;  %4674 = vst [vmem:[#allocation85_spill] sm:$0xff] %v3816_v52  ;;  %v3820_v40 = vld [vmem:[#allocation11 + $0xc8] sm:$0xff] }
 0x280   : > { %1096 = vmatpush1.msra.mxu1 %v3794_v60  ;;  %2509 = vmatpush3.msra.mxu0 %v3796_v35  ;;  %4675 = vst [vmem:[#allocation86_spill] sm:$0xff] %v3820_v40  ;;  %v3824_v35 = vld [vmem:[#allocation11 + $0xc0] sm:$0xff]  ;;  %v3826_v60 = vld [vmem:[#allocation11 + $0xd0] sm:$0xff] }
 0x281   : > { %1097 = vmatprep.subr.mxu1 %v3800_v41  ;;  %2510 = vmatprep.subr.mxu0 %v4648_v34  ;;  %4676 = vst [vmem:[#allocation87_spill] sm:$0xff] %v3824_v35  ;;  %4677 = vst [vmem:[#allocation88_spill] sm:$0xff] %v3826_v60  ;;  %v3830_v41 = vld [vmem:[#allocation11 + $0xb0] sm:$0xff] }
 0x282   : > { %1098 = vmatpush1.msra.mxu1 %v3804_v39  ;;  %2511 = vmatpush3.msra.mxu0 %v3806_v36  ;;  %4678 = vst [vmem:[#allocation89_spill] sm:$0xff] %v3830_v41  ;;  %v3834_v36 = vld [vmem:[#allocation11 + $0xa8] sm:$0xff]  ;;  %v3836_v39 = vld [vmem:[#allocation11 + $0xb8] sm:$0xff] }
 0x283   : > { %1099 = vmatprep.subr.mxu1 %v3810_v38  ;;  %2512 = vmatprep.subr.mxu0 %v4648_v34  ;;  %4679 = vst [vmem:[#allocation90_spill] sm:$0xff] %v3834_v36  ;;  %4680 = vst [vmem:[#allocation91_spill] sm:$0xff] %v3836_v39  ;;  %v3840_v38 = vld [vmem:[#allocation11 + $0x98] sm:$0xff] }
 0x284   : > { %1100 = vmatpush1.msra.mxu1 %v3814_v37  ;;  %2513 = vmatpush3.msra.mxu0 %v3816_v52  ;;  %4681 = vst [vmem:[#allocation92_spill] sm:$0xff] %v3840_v38  ;;  %v3844_v52 = vld [vmem:[#allocation11 + $0x90] sm:$0xff]  ;;  %v3846_v37 = vld [vmem:[#allocation11 + $0xa0] sm:$0xff] }
 0x285   : > { %1101 = vmatprep.subr.mxu1 %v3820_v40  ;;  %2514 = vmatprep.subr.mxu0 %v4648_v34  ;;  %4682 = vst [vmem:[#allocation93_spill] sm:$0xff] %v3844_v52  ;;  %4683 = vst [vmem:[#allocation94_spill] sm:$0xff] %v3846_v37  ;;  %v3850_v40 = vld [vmem:[#allocation11 + $0x80] sm:$0xff] }
 0x286   : > { %1102 = vmatpush1.msra.mxu1 %v3824_v35  ;;  %2515 = vmatpush3.msra.mxu0 %v3826_v60  ;;  %4684 = vst [vmem:[#allocation95_spill] sm:$0xff] %v3850_v40  ;;  %v3854_v60 = vld [vmem:[#allocation11 + $0x78] sm:$0xff]  ;;  %v3856_v35 = vld [vmem:[#allocation11 + $0x88] sm:$0xff] }
 0x287   : > { %1103 = vmatprep.subr.mxu1 %v3830_v41  ;;  %2516 = vmatprep.subr.mxu0 %v4648_v34  ;;  %4685 = vst [vmem:[#allocation96_spill] sm:$0xff] %v3854_v60  ;;  %4686 = vst [vmem:[#allocation97_spill] sm:$0xff] %v3856_v35  ;;  %v3860_v41 = vld [vmem:[#allocation11 + $0x68] sm:$0xff] }
 0x288   : > { %1104 = vmatpush1.msra.mxu1 %v3834_v36  ;;  %2517 = vmatpush3.msra.mxu0 %v3836_v39  ;;  %4687 = vst [vmem:[#allocation98_spill] sm:$0xff] %v3860_v41  ;;  %v3864_v39 = vld [vmem:[#allocation11 + $0x60] sm:$0xff]  ;;  %v3866_v36 = vld [vmem:[#allocation11 + $0x70] sm:$0xff] }
 0x289   : > { %1105 = vmatprep.subr.mxu1 %v3840_v38  ;;  %2518 = vmatprep.subr.mxu0 %v4648_v34  ;;  %4688 = vst [vmem:[#allocation99_spill] sm:$0xff] %v3864_v39  ;;  %4689 = vst [vmem:[#allocation100_spill] sm:$0xff] %v3866_v36  ;;  %v3870_v38 = vld [vmem:[#allocation11 + $0x50] sm:$0xff] }
 0x28a   : > { %1106 = vmatpush1.msra.mxu1 %v3844_v52  ;;  %2519 = vmatpush3.msra.mxu0 %v3846_v37  ;;  %4690 = vst [vmem:[#allocation101_spill] sm:$0xff] %v3870_v38  ;;  %v3874_v37 = vld [vmem:[#allocation11 + $0x48] sm:$0xff]  ;;  %v3876_v52 = vld [vmem:[#allocation11 + $0x58] sm:$0xff] }
 0x28b   : > { %1107 = vmatprep.subr.mxu1 %v3850_v40  ;;  %2520 = vmatprep.subr.mxu0 %v4648_v34  ;;  %4691 = vst [vmem:[#allocation102_spill] sm:$0xff] %v3876_v52  ;;  %v3880_v40 = vld [vmem:[#allocation11 + $0x38] sm:$0xff] }
 0x28c   : > { %1108 = vmatpush1.msra.mxu1 %v3854_v60  ;;  %2521 = vmatpush3.msra.mxu0 %v3856_v35  ;;  %4692 = vst [vmem:[#allocation103_spill] sm:$0xff] %v3880_v40  ;;  %v3884_v35 = vld [vmem:[#allocation11 + $0x30] sm:$0xff]  ;;  %v3886_v60 = vld [vmem:[#allocation11 + $0x40] sm:$0xff] }
 0x28d   : > { %1109 = vmatprep.subr.mxu1 %v3860_v41  ;;  %2522 = vmatprep.subr.mxu0 %v4648_v34  ;;  %4693 = vst [vmem:[#allocation104_spill] sm:$0xff] %v3884_v35  ;;  %4694 = vst [vmem:[#allocation105_spill] sm:$0xff] %v3886_v60  ;;  %v3890_v41 = vld [vmem:[#allocation11 + $0x20] sm:$0xff] }
 0x28e   : > { %1110 = vmatpush1.msra.mxu1 %v3864_v39  ;;  %2523 = vmatpush3.msra.mxu0 %v3866_v36  ;;  %4695 = vst [vmem:[#allocation106_spill] sm:$0xff] %v3890_v41  ;;  %v3894_v36 = vld [vmem:[#allocation11 + $0x18] sm:$0xff]  ;;  %v3896_v39 = vld [vmem:[#allocation11 + $0x28] sm:$0xff] }
 0x28f   : > { %1111 = vmatprep.subr.mxu1 %v3870_v38  ;;  %2524 = vmatprep.subr.mxu0 %v4648_v34  ;;  %4696 = vst [vmem:[#allocation107_spill] sm:$0xff] %v3894_v36  ;;  %4697 = vst [vmem:[#allocation108_spill] sm:$0xff] %v3896_v39  ;;  %v3900_v38 = vld [vmem:[#allocation11 + $0x8] sm:$0xff] }
 0x290   : > { %1112 = vmatpush1.msra.mxu1 %v3874_v37  ;;  %2525 = vmatpush3.msra.mxu0 %v3876_v52  ;;  %4698 = vst [vmem:[#allocation109_spill] sm:$0xff] %v3900_v38  ;;  %v3905_v52 = vld [vmem:[%s4423_s5] ss:$0 sm:$0xff] }
 0x291   : > { %1113 = vmatprep.subr.mxu1 %v3880_v40  ;;  %2526 = vmatprep.subr.mxu0 %v4648_v34  ;;  %4699 = vst [vmem:[#allocation110_spill] sm:$0xff] %v3905_v52  ;;  %v3909_v40 = vld [vmem:[#allocation11] sm:$0xff] }
 0x292   : > { %1114 = vmatpush1.msra.mxu1 %v3884_v35  ;;  %2527 = vmatpush3.msra.mxu0 %v3886_v60  ;;  %4700 = vst [vmem:[#allocation111_spill] sm:$0xff] %v3909_v40  ;;  %v3913_v35 = vld [vmem:[#allocation11 + $0x10] sm:$0xff]  ;;  %v766_v60 = vadd.f32 %v3905_v52, %v3750_v56  ;;  %v3950_v52 = vld [vmem:[#allocation14 + $0x148] sm:$0xff] }
 0x293   : > { %1115 = vmatprep.subr.mxu1 %v3890_v41  ;;  %2528 = vmatprep.subr.mxu0 %v4648_v34  ;;  %4701 = vst [vmem:[#allocation112_spill] sm:$0xff] %v3913_v35  ;;  %v3921_v41 = vld [vmem:[#allocation14 + $0x170] sm:$0xff]  ;;  %4711 = vst [vmem:[#allocation122_spill] sm:$0xff] %v3950_v52 }
 0x294   : > { %1116 = vmatpush1.msra.mxu1 %v3894_v36  ;;  %2529 = vmatpush3.msra.mxu0 %v3896_v39  ;;  %4702 = vst [vmem:[#allocation113_spill] sm:$0xff] %v3921_v41  ;;  %v3926_v39 = vld [vmem:[#allocation14 + $0x168] sm:$0xff]  ;;  %v3930_v36 = vld [vmem:[#allocation14 + $0x178] sm:$0xff]  ;;  %v3933_v56 = vld [vmem:[#allocation14 + $0x150] sm:$0xff] }
 0x295   : > { %1117 = vmatprep.subr.mxu1 %v3900_v38  ;;  %2530 = vmatprep.subr.mxu0 %v4648_v34  ;;  %4703 = vst [vmem:[#allocation114_spill] sm:$0xff] %v3926_v39  ;;  %v3928_v38 = vld [vmem:[#allocation14 + $0x158] sm:$0xff]  ;;  %4705 = vst [vmem:[#allocation116_spill] sm:$0xff] %v3930_v36 }
 0x296   : > { %1118 = vmatpush1.msra.mxu1 %v3909_v40  ;;  %1151 = vmatprep.mubr.f32.mxu1 %v4648_v34  ;;  %4704 = vst [vmem:[#allocation115_spill] sm:$0xff] %v3928_v38  ;;  %4706 = vst [vmem:[#allocation117_spill] sm:$0xff] %v3933_v56  ;;  %v3940_v40 = vld [vmem:[#allocation14 + $0x160] sm:$0xff] }
 0x297   : > { %2531 = vmatpush3.msra.mxu0 %v3913_v35  ;;  %2532 = vmatprep.mubr.msk.f32.mxu0 %vm3127_vm0, %v4648_v34  ;;  %v3937_v35 = vld [vmem:[#allocation14 + $0x140] sm:$0xff]  ;;  %4708 = vst [vmem:[#allocation119_spill] sm:$0xff] %v3940_v40 }
 0x298   : > { %1152 = vmatmul.mubr.f32.vlgmr.msra.gmra.mxu1 %v766_v60  ;;  %2533 = vmatmul.mubr.f32.vlgmr.msra.gmra.mxu0 %v766_v60  ;;  %4707 = vst [vmem:[#allocation118_spill] sm:$0xff] %v3937_v35  ;;  %v3943_v60 = vld [vmem:[#allocation14 + $0x138] sm:$0xff] }
 0x299   : > { %1313 = vmatprep.subr.mxu1 %v3921_v41  ;;  %1377 = vmatprep.mubr.f32.mxu1 %v4648_v34  ;;  %4709 = vst [vmem:[#allocation120_spill] sm:$0xff] %v3943_v60  ;;  %v3947_v41 = vld [vmem:[#allocation14 + $0x128] sm:$0xff] }
 0x29a   : > { %1314 = vmatpush1.msra.mxu1 %v3926_v39  ;;  %2535 = vmatprep.subr.mxu0 %v4648_v34  ;;  %4710 = vst [vmem:[#allocation121_spill] sm:$0xff] %v3947_v41  ;;  %v3953_v39 = vld [vmem:[#allocation14 + $0x120] sm:$0xff] }
 0x29b   : > { %1315 = vmatprep.subr.mxu1 %v3928_v38  ;;  %2536 = vmatpush3.msra.mxu0 %v3930_v36  ;;  %4712 = vst [vmem:[#allocation123_spill] sm:$0xff] %v3953_v39  ;;  %v3957_v38 = vld [vmem:[#allocation14 + $0x110] sm:$0xff] }
 0x29c   : > { %1316 = vmatpush1.msra.mxu1 %v3933_v56  ;;  %2537 = vmatprep.subr.mxu0 %v4648_v34  ;;  %4713 = vst [vmem:[#allocation124_spill] sm:$0xff] %v3957_v38  ;;  %v3960_v36 = vld [vmem:[#allocation14 + $0x130] sm:$0xff]  ;;  %v3963_v56 = vld [vmem:[#allocation14 + $0x108] sm:$0xff] }
 0x29d   : > { %1317 = vmatprep.subr.mxu1 %v3937_v35  ;;  %2538 = vmatpush3.msra.mxu0 %v3940_v40  ;;  %4714 = vst [vmem:[#allocation125_spill] sm:$0xff] %v3960_v36  ;;  %4715 = vst [vmem:[#allocation126_spill] sm:$0xff] %v3963_v56  ;;  %v3967_v35 = vld [vmem:[#allocation14 + $0xf8] sm:$0xff] }
 0x29e   : > { %1318 = vmatpush1.msra.mxu1 %v3943_v60  ;;  %2539 = vmatprep.subr.mxu0 %v4648_v34  ;;  %4716 = vst [vmem:[#allocation127_spill] sm:$0xff] %v3967_v35  ;;  %v3970_v40 = vld [vmem:[#allocation14 + $0x118] sm:$0xff]  ;;  %v3973_v60 = vld [vmem:[#allocation14 + $0xf0] sm:$0xff] }
 0x29f   : > { %1319 = vmatprep.subr.mxu1 %v3947_v41  ;;  %2540 = vmatpush3.msra.mxu0 %v3950_v52  ;;  %4717 = vst [vmem:[#allocation128_spill] sm:$0xff] %v3970_v40  ;;  %4718 = vst [vmem:[#allocation129_spill] sm:$0xff] %v3973_v60  ;;  %v3977_v41 = vld [vmem:[#allocation14 + $0xe0] sm:$0xff] }
 0x2a0   : > { %1320 = vmatpush1.msra.mxu1 %v3953_v39  ;;  %2541 = vmatprep.subr.mxu0 %v4648_v34  ;;  %4719 = vst [vmem:[#allocation130_spill] sm:$0xff] %v3977_v41  ;;  %v3980_v52 = vld [vmem:[#allocation14 + $0x100] sm:$0xff]  ;;  %v3983_v39 = vld [vmem:[#allocation14 + $0xd8] sm:$0xff] }
 0x2a1   : > { %1321 = vmatprep.subr.mxu1 %v3957_v38  ;;  %2542 = vmatpush3.msra.mxu0 %v3960_v36  ;;  %4720 = vst [vmem:[#allocation131_spill] sm:$0xff] %v3980_v52  ;;  %4721 = vst [vmem:[#allocation132_spill] sm:$0xff] %v3983_v39  ;;  %v3987_v38 = vld [vmem:[#allocation14 + $0xc8] sm:$0xff] }
 0x2a2   : > { %1322 = vmatpush1.msra.mxu1 %v3963_v56  ;;  %2543 = vmatprep.subr.mxu0 %v4648_v34  ;;  %4722 = vst [vmem:[#allocation133_spill] sm:$0xff] %v3987_v38  ;;  %v3990_v36 = vld [vmem:[#allocation14 + $0xe8] sm:$0xff]  ;;  %v3993_v56 = vld [vmem:[#allocation14 + $0xc0] sm:$0xff] }
 0x2a3   : > { %1323 = vmatprep.subr.mxu1 %v3967_v35  ;;  %2544 = vmatpush3.msra.mxu0 %v3970_v40  ;;  %4723 = vst [vmem:[#allocation134_spill] sm:$0xff] %v3990_v36  ;;  %4724 = vst [vmem:[#allocation135_spill] sm:$0xff] %v3993_v56  ;;  %v3997_v35 = vld [vmem:[#allocation14 + $0xb0] sm:$0xff] }
 0x2a4   : > { %1324 = vmatpush1.msra.mxu1 %v3973_v60  ;;  %2545 = vmatprep.subr.mxu0 %v4648_v34  ;;  %4725 = vst [vmem:[#allocation136_spill] sm:$0xff] %v3997_v35  ;;  %v4000_v40 = vld [vmem:[#allocation14 + $0xd0] sm:$0xff]  ;;  %v4003_v60 = vld [vmem:[#allocation14 + $0xa8] sm:$0xff] }
 0x2a5   : > { %1325 = vmatprep.subr.mxu1 %v3977_v41  ;;  %2546 = vmatpush3.msra.mxu0 %v3980_v52  ;;  %4726 = vst [vmem:[#allocation137_spill] sm:$0xff] %v4000_v40  ;;  %4727 = vst [vmem:[#allocation138_spill] sm:$0xff] %v4003_v60  ;;  %v4007_v41 = vld [vmem:[#allocation14 + $0x98] sm:$0xff] }
 0x2a6   : > { %1326 = vmatpush1.msra.mxu1 %v3983_v39  ;;  %2547 = vmatprep.subr.mxu0 %v4648_v34  ;;  %4728 = vst [vmem:[#allocation139_spill] sm:$0xff] %v4007_v41  ;;  %v4010_v52 = vld [vmem:[#allocation14 + $0xb8] sm:$0xff]  ;;  %v4013_v39 = vld [vmem:[#allocation14 + $0x90] sm:$0xff] }
 0x2a7   : > { %1327 = vmatprep.subr.mxu1 %v3987_v38  ;;  %2548 = vmatpush3.msra.mxu0 %v3990_v36  ;;  %4729 = vst [vmem:[#allocation140_spill] sm:$0xff] %v4010_v52  ;;  %4730 = vst [vmem:[#allocation141_spill] sm:$0xff] %v4013_v39  ;;  %v4017_v38 = vld [vmem:[#allocation14 + $0x80] sm:$0xff] }
 0x2a8   : > { %1328 = vmatpush1.msra.mxu1 %v3993_v56  ;;  %2549 = vmatprep.subr.mxu0 %v4648_v34  ;;  %4731 = vst [vmem:[#allocation142_spill] sm:$0xff] %v4017_v38  ;;  %v4020_v36 = vld [vmem:[#allocation14 + $0xa0] sm:$0xff]  ;;  %v4023_v56 = vld [vmem:[#allocation14 + $0x78] sm:$0xff] }
 0x2a9   : > { %1329 = vmatprep.subr.mxu1 %v3997_v35  ;;  %2550 = vmatpush3.msra.mxu0 %v4000_v40  ;;  %4732 = vst [vmem:[#allocation143_spill] sm:$0xff] %v4020_v36  ;;  %4733 = vst [vmem:[#allocation144_spill] sm:$0xff] %v4023_v56  ;;  %v4027_v35 = vld [vmem:[#allocation14 + $0x68] sm:$0xff] }
 0x2aa   : > { %1330 = vmatpush1.msra.mxu1 %v4003_v60  ;;  %2551 = vmatprep.subr.mxu0 %v4648_v34  ;;  %4734 = vst [vmem:[#allocation145_spill] sm:$0xff] %v4027_v35  ;;  %v4030_v40 = vld [vmem:[#allocation14 + $0x88] sm:$0xff]  ;;  %v4033_v60 = vld [vmem:[#allocation14 + $0x60] sm:$0xff] }
 0x2ab   : > { %1331 = vmatprep.subr.mxu1 %v4007_v41  ;;  %2552 = vmatpush3.msra.mxu0 %v4010_v52  ;;  %4735 = vst [vmem:[#allocation146_spill] sm:$0xff] %v4030_v40  ;;  %4736 = vst [vmem:[#allocation147_spill] sm:$0xff] %v4033_v60  ;;  %v4037_v41 = vld [vmem:[#allocation14 + $0x50] sm:$0xff] }
 0x2ac   : > { %1332 = vmatpush1.msra.mxu1 %v4013_v39  ;;  %2553 = vmatprep.subr.mxu0 %v4648_v34  ;;  %4737 = vst [vmem:[#allocation148_spill] sm:$0xff] %v4037_v41  ;;  %v4040_v52 = vld [vmem:[#allocation14 + $0x70] sm:$0xff]  ;;  %v4043_v39 = vld [vmem:[#allocation14 + $0x48] sm:$0xff] }
 0x2ad   : > { %1333 = vmatprep.subr.mxu1 %v4017_v38  ;;  %2554 = vmatpush3.msra.mxu0 %v4020_v36  ;;  %4738 = vst [vmem:[#allocation149_spill] sm:$0xff] %v4040_v52  ;;  %4739 = vst [vmem:[#allocation150_spill] sm:$0xff] %v4043_v39  ;;  %v4047_v38 = vld [vmem:[#allocation14 + $0x38] sm:$0xff] }
 0x2ae   : > { %1334 = vmatpush1.msra.mxu1 %v4023_v56  ;;  %2555 = vmatprep.subr.mxu0 %v4648_v34  ;;  %4740 = vst [vmem:[#allocation151_spill] sm:$0xff] %v4047_v38  ;;  %v4050_v36 = vld [vmem:[#allocation14 + $0x58] sm:$0xff]  ;;  %v4053_v56 = vld [vmem:[#allocation14 + $0x30] sm:$0xff] }
 0x2af   : > { %1335 = vmatprep.subr.mxu1 %v4027_v35  ;;  %2556 = vmatpush3.msra.mxu0 %v4030_v40  ;;  %v4057_v35 = vld [vmem:[#allocation14 + $0x20] sm:$0xff] }
 0x2b0   : > { %1336 = vmatpush1.msra.mxu1 %v4033_v60  ;;  %2557 = vmatprep.subr.mxu0 %v4648_v34  ;;  %v4060_v40 = vld [vmem:[#allocation14 + $0x40] sm:$0xff]  ;;  %v4063_v60 = vld [vmem:[#allocation14 + $0x18] sm:$0xff] }
 0x2b1   : > { %1337 = vmatprep.subr.mxu1 %v4037_v41  ;;  %2558 = vmatpush3.msra.mxu0 %v4040_v52  ;;  %v4067_v41 = vld [vmem:[#allocation14 + $0x8] sm:$0xff] }
 0x2b2   : > { %1338 = vmatpush1.msra.mxu1 %v4043_v39  ;;  %2559 = vmatprep.subr.mxu0 %v4648_v34  ;;  %v4070_v52 = vld [vmem:[#allocation14 + $0x28] sm:$0xff]  ;;  %v4073_v39 = vld [vmem:[#allocation14] sm:$0xff] }
 0x2b3   : > { %1339 = vmatprep.subr.mxu1 %v4047_v38  ;;  %2560 = vmatpush3.msra.mxu0 %v4050_v36  ;;  %v4078_v38 = vld [vmem:[#allocation14 + $0x10] sm:$0xff] }
 0x2b4   : > { %1340 = vmatpush1.msra.mxu1 %v4053_v56  ;;  %2561 = vmatprep.subr.mxu0 %v4648_v34 }
 0x2b5   : > { %1341 = vmatprep.subr.mxu1 %v4057_v35  ;;  %2562 = vmatpush3.msra.mxu0 %v4060_v40 }
 0x2b6   : > { %1342 = vmatpush1.msra.mxu1 %v4063_v60  ;;  %2563 = vmatprep.subr.mxu0 %v4648_v34 }
 0x2b7   : > { %1343 = vmatprep.subr.mxu1 %v4067_v41  ;;  %2564 = vmatpush3.msra.mxu0 %v4070_v52 }
 0x2b8   : > { %1344 = vmatpush1.msra.mxu1 %v4073_v39  ;;  %2565 = vmatprep.subr.mxu0 %v4648_v34 }
 0x2b9   : > { %1378 = vmatmul.mubr.f32.vlgmr.msra.gmra.mxu1 %v3545_v33  ;;  %2566 = vmatpush3.msra.mxu0 %v4078_v38 }
 0x2ba   : > { %2567 = vmatprep.mubr.msk.f32.mxu0 %vm3127_vm0, %v4648_v34  ;;  %1474 = vmatprep.subr.mxu1 %v3449_v1 }
 0x2bb   : > { %2568 = vmatmul.mubr.f32.vlgmr.msra.gmra.mxu0 %v3545_v33  ;;  %1475 = vmatpush1.msra.mxu1 %v3451_v2 }
 0x2bc   : > { %1476 = vmatprep.subr.mxu1 %v3453_v3  ;;  %1538 = vmatprep.mubr.f32.mxu1 %v4648_v34 }
 0x2bd   : > { %1477 = vmatpush1.msra.mxu1 %v3456_v4  ;;  %2570 = vmatprep.subr.mxu0 %v4648_v34 }
 0x2be   : > { %1478 = vmatprep.subr.mxu1 %v3459_v5  ;;  %2572 = vmatprep.mubr.msk.f32.mxu0 %vm3127_vm0, %v4648_v34 }
 0x2bf   : > { %1479 = vmatpush1.msra.mxu1 %v3462_v6 }
 0x2c0   : > { %1480 = vmatprep.subr.mxu1 %v3465_v7 }
 0x2c1   : > { %1481 = vmatpush1.msra.mxu1 %v3468_v8 }
 0x2c2   : > { %1482 = vmatprep.subr.mxu1 %v3471_v9  ;;  %v1228_v9 = vld [vmem:[%s4741_s14] sm:$0x7] }
 0x2c3   : > { %1483 = vmatpush1.msra.mxu1 %v3474_v10  ;;  %v1296_v10 = vld [vmem:[%s4742_s19] sm:$0x7] }
 0x2c4   : > { %1484 = vmatprep.subr.mxu1 %v3477_v11 }
 0x2c5   : > { %1485 = vmatpush1.msra.mxu1 %v3480_v12  ;;  %v4133_v12 = vrot.slane %v1228_v9, %v3610_v49 }
 0x2c6   : > { %1486 = vmatprep.subr.mxu1 %v3483_v13  ;;  %v4136_v13 = vrot.slane %v1296_v10, %v3610_v49 }
 0x2c7   : > { %1487 = vmatpush1.msra.mxu1 %v3486_v14 }
 0x2c8   : > { %1488 = vmatprep.subr.mxu1 %v3489_v15 }
 0x2c9   : > { %1489 = vmatpush1.msra.mxu1 %v3492_v16 }
 0x2ca   : > { %1490 = vmatprep.subr.mxu1 %v3495_v17 }
 0x2cb   : > { %1491 = vmatpush1.msra.mxu1 %v3498_v18 }
 0x2cc   : > { %1492 = vmatprep.subr.mxu1 %v3501_v19 }
 0x2cd   : > { %1493 = vmatpush1.msra.mxu1 %v3504_v20 }
 0x2ce   : > { %1494 = vmatprep.subr.mxu1 %v3507_v21 }
 0x2cf   : > { %1495 = vmatpush1.msra.mxu1 %v3510_v22  ;;  %v4141_v22 = vrot.slane %v1296_v10, %v3613_v51 }
 0x2d0   : > { %1496 = vmatprep.subr.mxu1 %v3513_v23 }
 0x2d1   : > { %1497 = vmatpush1.msra.mxu1 %v3516_v24 }
 0x2d2   : > { %1498 = vmatprep.subr.mxu1 %v3519_v25  ;;  %v4144_v25 = vrot.slane %v1228_v9, %v3613_v51 }
 0x2d3   : > { %1499 = vmatpush1.msra.mxu1 %v3522_v26 }
 0x2d4   : > { %1500 = vmatprep.subr.mxu1 %v3525_v27 }
 0x2d5   : > { %1501 = vmatpush1.msra.mxu1 %v3528_v28 }
 0x2d6   : > { %1502 = vmatprep.subr.mxu1 %v3531_v29 }
 0x2d7   : > { %1503 = vmatpush1.msra.mxu1 %v3534_v30 }
 0x2d8   : > { %1504 = vmatprep.subr.mxu1 %v3537_v31 }
 0x2d9   : > { %1505 = vmatpush1.msra.mxu1 %v3540_v32  ;;  %v1240_v32 = vsub.s32 2, %v3607_v48 }
 0x2da   : > { %1685 = vmatprep.subr.mxu1 %v3627_v59 }
 0x2db   : > { %v4149_v49 = vrot.slane %v1296_v10, %v1240_v32  ;;  %v4151_v59 = vrot.slane %v1228_v9, %v1240_v32  ;;  %v4772_v32 = vld [vmem:[#allocation37_spill] sm:$0xff] }
 0x337   : > { %v1083_v1 = vpop.f32.mrf.mxu0  ;;  %v1012_v6 = vpop.f32.mrf.mxu1 }
 0x339   : > { %v2499_v2 = vpop.f32.mrf.mxu0  ;;  %v1014_v7 = vpop.f32.mrf.mxu1 }
 0x358   : > { %v1224_v3 = vpop.f32.mrf.mxu0  ;;  %v1153_v8 = vpop.f32.mrf.mxu1 }
 0x359   : > { %v1225_v4 = vadd.f32 %v1224_v3, %v1083_v1  ;;  %v1154_v11 = vadd.f32 %v1153_v8, %v1012_v6 }
 0x35a   : > { %v2534_v5 = vpop.f32.mrf.mxu0  ;;  %v1155_v14 = vpop.f32.mrf.mxu1 }
 0x35b   : > { %v1245_v16 = vadd.f32 %v4133_v12, %v1154_v11  ;;  %v1156_v24 = vadd.f32 %v1155_v14, %v1014_v7  ;;  %v1247_v3 = vadd.f32 %v4151_v59, %v1225_v4  ;;  %v4759_v4 = vld [vmem:[#allocation65_spill] sm:$0xff] }
 0x35d   : > { %v1246_v27 = vadd.f32 %v4144_v25, %v1156_v24  ;;  %v4765_v24 = vld [vmem:[#allocation30_spill] sm:$0xff] }
 0x379   : > { %v1379_v15 = vpop.f32.mrf.mxu1 }
 0x37a   : > { %v1380_v17 = vadd.f32 %v1379_v15, %v4136_v13  ;;  %v4760_v15 = vld [vmem:[#allocation42_spill] sm:$0xff] }
 0x37b   : > { %v1450_v18 = vpop.f32.mrf.mxu0  ;;  %v1381_v23 = vpop.f32.mrf.mxu1 }
 0x37c   : > { %v1454_v19 = vadd.f32 %v1380_v17, %v1245_v16  ;;  %v1382_v26 = vadd.f32 %v1381_v23, %v4141_v22  ;;  %v1451_v1 = vadd.f32 %v1450_v18, %v4149_v49  ;;  %v4761_v18 = vld [vmem:[#allocation43_spill] sm:$0xff]  ;;  %v4764_v23 = vld [vmem:[#allocation29_spill] sm:$0xff] }
 0x37d   : > { %v2569_v20 = vpop.f32.mrf.mxu0 }
 0x37e   : > { %v2335_v21 = vmul.f32 -1.442695, %v1454_v19  ;;  %v1461_v28 = vadd.f32 %v1382_v26, %v1246_v27  ;;  %v4762_v20 = vld [vmem:[#allocation44_spill] sm:$0xff]  ;;  %v4766_v26 = vld [vmem:[#allocation31_spill] sm:$0xff] }
 0x37f   : > { %v4767_v27 = vld [vmem:[#allocation32_spill] sm:$0xff] }
 0x380   : > { %2798 = vpow2.f32 %v2335_v21  ;;  %v2336_v29 = vmul.f32 -1.442695, %v1461_v28  ;;  %v4763_v21 = vld [vmem:[#allocation45_spill] sm:$0xff] }
 0x381   : > { %v4768_v28 = vld [vmem:[#allocation33_spill] sm:$0xff] }
 0x382   : > { %2800 = vpow2.f32 %v2336_v29  ;;  %v4769_v29 = vld [vmem:[#allocation34_spill] sm:$0xff] }
 0x38d   : > { %v2799_v30 = vpop.eup %2798 }
 0x38e   : > { %v1458_v31 = vadd.f32 1.0, %v2799_v30  ;;  %v4770_v30 = vld [vmem:[#allocation35_spill] sm:$0xff] }
 0x38f   : > { %v2801_v51 = vpop.eup %2800 }
 0x390   : > { %2802 = vrcp.f32 %v1458_v31  ;;  %v1465_v6 = vadd.f32 1.0, %v2801_v51  ;;  %v4771_v31 = vld [vmem:[#allocation36_spill] sm:$0xff]  ;;  %v4774_v51 = vld [vmem:[#allocation39_spill] sm:$0xff] }
 0x39d   : > { %v2803_v2 = vpop.eup %2802 }
 0x39e   : > { %v1468_v5 = vmul.f32 %v2803_v2, %v1451_v1  ;;  %v4773_v1 = vld [vmem:[#allocation38_spill] sm:$0xff]  ;;  %v4775_v2 = vld [vmem:[#allocation40_spill] sm:$0xff] }
 0x3a0   : > { %v1469_v7 = vadd.f32 %v1468_v5, %v1247_v3  ;;  %v4776_v3 = vld [vmem:[#allocation41_spill] sm:$0xff]  ;;  %v4777_v5 = vld [vmem:[#allocation58_spill] sm:$0xff] }
 0x3a2   : > { %2804 = vtanh.f32 %v1469_v7  ;;  %v4779_v7 = vld [vmem:[#allocation64_spill] sm:$0xff] }
 0x3a3   : > { %2806 = vrcp.f32 %v1465_v6  ;;  %v4778_v6 = vld [vmem:[#allocation61_spill] sm:$0xff] }
 0x3af   : > { %v2805_v8 = vpop.eup %2804 }
 0x3b0   : > { %v1471_v11 = vsub.f32 %v3545_v33, %v2805_v8  ;;  %v2807_v14 = vpop.eup %2806  ;;  %v4743_v33 = vld [vmem:[#allocation46_spill] sm:$0xff] }
 0x3b2   : > { %v1472_v48 = vmul.f32 %v2807_v14, %v1471_v11 }
 0x3b4   : > { %v4156_v10 = vadd.f32 %v2805_v8, %v1472_v48 }
 0x3b6   : > { %1539 = vmatmul.mubr.f32.vlgmr.msra.gmra.mxu1 %v4156_v10 }
 0x3b7   : > { %1686 = vmatpush1.msra.mxu1 %v3639_v61  ;;  %1749 = vmatprep.mubr.f32.mxu1 %v4648_v34  ;;  %v4744_v61 = vld [vmem:[#allocation47_spill] sm:$0xff] }
 0x3b8   : > { %1687 = vmatprep.subr.mxu1 %v3641_v62  ;;  %v4745_v62 = vld [vmem:[#allocation48_spill] sm:$0xff] }
 0x3b9   : > { %1688 = vmatpush1.msra.mxu1 %v3645_v63  ;;  %v4746_v63 = vld [vmem:[#allocation49_spill] sm:$0xff] }
 0x3ba   : > { %1689 = vmatprep.subr.mxu1 %v3648_v47  ;;  %v4747_v47 = vld [vmem:[#allocation50_spill] sm:$0xff] }
 0x3bb   : > { %1690 = vmatpush1.msra.mxu1 %v3652_v50  ;;  %v4754_v50 = vld [vmem:[#allocation57_spill] sm:$0xff] }
 0x3bc   : > { %1691 = vmatprep.subr.mxu1 %v3655_v54  ;;  %v4755_v54 = vld [vmem:[#allocation59_spill] sm:$0xff] }
 0x3bd   : > { %1692 = vmatpush1.msra.mxu1 %v3658_v55  ;;  %v4756_v55 = vld [vmem:[#allocation60_spill] sm:$0xff] }
 0x3be   : > { %1693 = vmatprep.subr.mxu1 %v3661_v57  ;;  %v4757_v57 = vld [vmem:[#allocation62_spill] sm:$0xff] }
 0x3bf   : > { %1694 = vmatpush1.msra.mxu1 %v3664_v58  ;;  %v4758_v58 = vld [vmem:[#allocation63_spill] sm:$0xff] }
 0x3c0   : > { %1695 = vmatprep.subr.mxu1 %v3667_v0  ;;  %v4748_v0 = vld [vmem:[#allocation51_spill] sm:$0xff] }
 0x3c1   : > { %1696 = vmatpush1.msra.mxu1 %v3670_v46  ;;  %v4749_v46 = vld [vmem:[#allocation52_spill] sm:$0xff] }
 0x3c2   : > { %1697 = vmatprep.subr.mxu1 %v3673_v45  ;;  %v4750_v45 = vld [vmem:[#allocation53_spill] sm:$0xff] }
 0x3c3   : > { %1698 = vmatpush1.msra.mxu1 %v3676_v44  ;;  %v4751_v44 = vld [vmem:[#allocation54_spill] sm:$0xff] }
 0x3c4   : > { %1699 = vmatprep.subr.mxu1 %v3679_v43  ;;  %v4752_v43 = vld [vmem:[#allocation55_spill] sm:$0xff] }
 0x3c5   : > { %1700 = vmatpush1.msra.mxu1 %v3682_v42  ;;  %v4753_v42 = vld [vmem:[#allocation56_spill] sm:$0xff] }
 0x3c6   : > { %1701 = vmatprep.subr.mxu1 %v4743_v33 }
 0x3c7   : > { %1702 = vmatpush1.msra.mxu1 %v4744_v61  ;;  %v4780_v61 = vld [vmem:[#allocation66_spill] sm:$0xff] }
 0x3c8   : > { %1703 = vmatprep.subr.mxu1 %v4745_v62  ;;  %v4781_v62 = vld [vmem:[#allocation67_spill] sm:$0xff] }
 0x3c9   : > { %1704 = vmatpush1.msra.mxu1 %v4746_v63  ;;  %v4782_v63 = vld [vmem:[#allocation68_spill] sm:$0xff] }
 0x3ca   : > { %1705 = vmatprep.subr.mxu1 %v4747_v47  ;;  %v4783_v47 = vld [vmem:[#allocation69_spill] sm:$0xff] }
 0x3cb   : > { %1706 = vmatpush1.msra.mxu1 %v4748_v0  ;;  %v4784_v0 = vld [vmem:[#allocation70_spill] sm:$0xff] }
 0x3cc   : > { %1707 = vmatprep.subr.mxu1 %v4749_v46  ;;  %v4785_v46 = vld [vmem:[#allocation71_spill] sm:$0xff] }
 0x3cd   : > { %1708 = vmatpush1.msra.mxu1 %v4750_v45  ;;  %v4787_v45 = vld [vmem:[#allocation73_spill] sm:$0xff] }
 0x3ce   : > { %1709 = vmatprep.subr.mxu1 %v4751_v44  ;;  %v4788_v44 = vld [vmem:[#allocation74_spill] sm:$0xff] }
 0x3cf   : > { %1710 = vmatpush1.msra.mxu1 %v4752_v43  ;;  %v4789_v43 = vld [vmem:[#allocation75_spill] sm:$0xff] }
 0x3d0   : > { %1711 = vmatprep.subr.mxu1 %v4753_v42  ;;  %v4790_v42 = vld [vmem:[#allocation76_spill] sm:$0xff] }
 0x3d1   : > { %1712 = vmatpush1.msra.mxu1 %v4754_v50  ;;  %v4791_v50 = vld [vmem:[#allocation77_spill] sm:$0xff] }
 0x3d2   : > { %1713 = vmatprep.subr.mxu1 %v4755_v54  ;;  %v4792_v54 = vld [vmem:[#allocation78_spill] sm:$0xff] }
 0x3d3   : > { %1714 = vmatpush1.msra.mxu1 %v4756_v55  ;;  %v4793_v55 = vld [vmem:[#allocation79_spill] sm:$0xff] }
 0x3d4   : > { %1715 = vmatprep.subr.mxu1 %v4757_v57  ;;  %v4794_v57 = vld [vmem:[#allocation80_spill] sm:$0xff] }
 0x3d5   : > { %1716 = vmatpush1.msra.mxu1 %v4758_v58  ;;  %v4795_v58 = vld [vmem:[#allocation81_spill] sm:$0xff] }
 0x3d6   : > { %1826 = vmatprep.subr.mxu1 %v4759_v4  ;;  %v4796_v4 = vld [vmem:[#allocation82_spill] sm:$0xff] }
 0x476   : > { %v1540_v9 = vpop.f32.mrf.mxu1 }
 0x477   : > { %v1541_v16 = vadd.f32 %v1540_v9, %v4760_v15  ;;  %v4797_v9 = vld [vmem:[#allocation83_spill] sm:$0xff]  ;;  %v4798_v15 = vld [vmem:[#allocation84_spill] sm:$0xff] }
 0x478   : > { %v1542_v17 = vpop.f32.mrf.mxu1 }
 0x479   : > { %v1543_v19 = vadd.f32 %v1542_v17, %v4761_v18  ;;  %2571 = vmatpush3.msra.mxu0 %v1541_v16  ;;  %v4799_v16 = vld [vmem:[#allocation85_spill] sm:$0xff]  ;;  %v4800_v17 = vld [vmem:[#allocation86_spill] sm:$0xff]  ;;  %v4801_v18 = vld [vmem:[#allocation87_spill] sm:$0xff] }
 0x47a   : > { %2573 = vmatmul.mubr.msk.f32.vlgmr.msra.gmra.mxu0 %vm695_vm1, %v4762_v20  ;;  %2575 = vmatprep.subr.mxu0 %v4648_v34  ;;  %v4803_v20 = vld [vmem:[#allocation89_spill] sm:$0xff] }
 0x47b   : > { %2576 = vmatpush3.msra.mxu0 %v1543_v19  ;;  %2577 = vmatprep.mubr.msk.f32.mxu0 %vm3127_vm0, %v4648_v34  ;;  %v4802_v19 = vld [vmem:[#allocation88_spill] sm:$0xff] }
 0x47c   : > { %2580 = vmatprep.subr.mxu0 %v4648_v34 }
 0x47e   : > { %2578 = vmatmul.mubr.msk.f32.vlgmr.msra.gmra.mxu0 %vm695_vm1, %v4763_v21  ;;  %v4804_v21 = vld [vmem:[#allocation90_spill] sm:$0xff] }
 0x47f   : > { %2581 = vmatpush3.msra.mxu0 %v4764_v23  ;;  %2612 = vmatprep.mubr.msk.f32.mxu0 %vm3127_vm0, %v4648_v34  ;;  %v4805_v23 = vld [vmem:[#allocation91_spill] sm:$0xff] }
 0x480   : > { %2582 = vmatprep.subr.mxu0 %v4648_v34 }
 0x481   : > { %2583 = vmatpush3.msra.mxu0 %v4765_v24  ;;  %v4806_v24 = vld [vmem:[#allocation92_spill] sm:$0xff] }
 0x482   : > { %2584 = vmatprep.subr.mxu0 %v4648_v34 }
 0x483   : > { %2585 = vmatpush3.msra.mxu0 %v4766_v26  ;;  %v4807_v26 = vld [vmem:[#allocation93_spill] sm:$0xff] }
 0x484   : > { %2586 = vmatprep.subr.mxu0 %v4648_v34 }
 0x485   : > { %2587 = vmatpush3.msra.mxu0 %v4767_v27  ;;  %v4808_v27 = vld [vmem:[#allocation94_spill] sm:$0xff] }
 0x486   : > { %2588 = vmatprep.subr.mxu0 %v4648_v34 }
 0x487   : > { %2589 = vmatpush3.msra.mxu0 %v4768_v28  ;;  %v4809_v28 = vld [vmem:[#allocation95_spill] sm:$0xff] }
 0x488   : > { %2590 = vmatprep.subr.mxu0 %v4648_v34 }
 0x489   : > { %2591 = vmatpush3.msra.mxu0 %v4769_v29  ;;  %v4810_v29 = vld [vmem:[#allocation96_spill] sm:$0xff] }
 0x48a   : > { %2592 = vmatprep.subr.mxu0 %v4648_v34 }
 0x48b   : > { %2593 = vmatpush3.msra.mxu0 %v4770_v30  ;;  %v4811_v30 = vld [vmem:[#allocation97_spill] sm:$0xff] }
 0x48c   : > { %2594 = vmatprep.subr.mxu0 %v4648_v34 }
 0x48d   : > { %2595 = vmatpush3.msra.mxu0 %v4771_v31  ;;  %v4812_v31 = vld [vmem:[#allocation98_spill] sm:$0xff] }
 0x48e   : > { %2596 = vmatprep.subr.mxu0 %v4648_v34 }
 0x48f   : > { %2597 = vmatpush3.msra.mxu0 %v4772_v32  ;;  %v4813_v32 = vld [vmem:[#allocation99_spill] sm:$0xff] }
 0x490   : > { %2598 = vmatprep.subr.mxu0 %v4648_v34 }
 0x491   : > { %2599 = vmatpush3.msra.mxu0 %v4773_v1  ;;  %v4814_v1 = vld [vmem:[#allocation100_spill] sm:$0xff] }
 0x492   : > { %2600 = vmatprep.subr.mxu0 %v4648_v34 }
 0x493   : > { %2601 = vmatpush3.msra.mxu0 %v4774_v51  ;;  %v4815_v51 = vld [vmem:[#allocation101_spill] sm:$0xff] }
 0x494   : > { %2602 = vmatprep.subr.mxu0 %v4648_v34 }
 0x495   : > { %2603 = vmatpush3.msra.mxu0 %v4775_v2  ;;  %v4816_v2 = vld [vmem:[#allocation102_spill] sm:$0xff] }
 0x496   : > { %2604 = vmatprep.subr.mxu0 %v4648_v34 }
 0x497   : > { %2605 = vmatpush3.msra.mxu0 %v4776_v3  ;;  %v4817_v3 = vld [vmem:[#allocation103_spill] sm:$0xff] }
 0x498   : > { %2606 = vmatprep.subr.mxu0 %v4648_v34 }
 0x499   : > { %2607 = vmatpush3.msra.mxu0 %v4777_v5  ;;  %v4818_v5 = vld [vmem:[#allocation104_spill] sm:$0xff] }
 0x49a   : > { %2608 = vmatprep.subr.mxu0 %v4648_v34 }
 0x49b   : > { %2609 = vmatpush3.msra.mxu0 %v4778_v6  ;;  %v4819_v6 = vld [vmem:[#allocation105_spill] sm:$0xff] }
 0x49c   : > { %2610 = vmatprep.subr.mxu0 %v4648_v34 }
 0x49d   : > { %2611 = vmatpush3.msra.mxu0 %v4779_v7  ;;  %v4820_v7 = vld [vmem:[#allocation106_spill] sm:$0xff] }
 0x49e   : > { %2615 = vmatprep.subr.mxu0 %v4648_v34 }
 0x53a   : > { %v4236_v8 = vpop.f32.mrf.mxu0 }
 0x53c   : > { %v2574_v11 = vpop.f32.mrf.mxu0 }
 0x53d   : > { %v4821_v11 = vld [vmem:[#allocation107_spill] sm:$0xff] }
 0x53e   : > { %v1681_v14 = vpop.f32.mrf.mxu0 }
 0x53f   : > { %v1682_v48 = vadd.f32 %v3755_v53, %v1681_v14  ;;  %v4786_v53 = vld [vmem:[#allocation72_spill] sm:$0xff] }
 0x540   : > { %v2579_v33 = vpop.f32.mrf.mxu0  ;;  %v4822_v14 = vld [vmem:[#allocation108_spill] sm:$0xff] }
 0x541   : > { %1750 = vmatmul.mubr.f32.vlgmr.msra.gmra.mxu1 %v1682_v48  ;;  %2613 = vmatmul.mubr.f32.vlgmr.msra.gmra.mxu0 %v1682_v48  ;;  %v4823_v48 = vld [vmem:[#allocation109_spill] sm:$0xff] }
 0x542   : > { %1827 = vmatpush1.msra.mxu1 %v4780_v61  ;;  %2616 = vmatpush3.msra.mxu0 %v4781_v62  ;;  %v4825_v61 = vld [vmem:[#allocation111_spill] sm:$0xff]  ;;  %v4826_v62 = vld [vmem:[#allocation112_spill] sm:$0xff] }
 0x543   : > { %1828 = vmatprep.subr.mxu1 %v4782_v63  ;;  %2617 = vmatprep.subr.mxu0 %v4648_v34  ;;  %v4827_v63 = vld [vmem:[#allocation113_spill] sm:$0xff] }
 0x544   : > { %1829 = vmatpush1.msra.mxu1 %v4783_v47  ;;  %2618 = vmatpush3.msra.mxu0 %v4784_v0  ;;  %v4828_v47 = vld [vmem:[#allocation114_spill] sm:$0xff]  ;;  %v4829_v0 = vld [vmem:[#allocation116_spill] sm:$0xff] }
 0x545   : > { %1830 = vmatprep.subr.mxu1 %v4785_v46  ;;  %2619 = vmatprep.subr.mxu0 %v4648_v34  ;;  %v4831_v46 = vld [vmem:[#allocation117_spill] sm:$0xff] }
 0x546   : > { %1831 = vmatpush1.msra.mxu1 %v4786_v53  ;;  %2620 = vmatpush3.msra.mxu0 %v4787_v45  ;;  %v4832_v53 = vld [vmem:[#allocation119_spill] sm:$0xff]  ;;  %v4833_v45 = vld [vmem:[#allocation118_spill] sm:$0xff] }
 0x547   : > { %1832 = vmatprep.subr.mxu1 %v4788_v44  ;;  %2621 = vmatprep.subr.mxu0 %v4648_v34  ;;  %v4834_v44 = vld [vmem:[#allocation120_spill] sm:$0xff] }
 0x548   : > { %1833 = vmatpush1.msra.mxu1 %v4789_v43  ;;  %2622 = vmatpush3.msra.mxu0 %v4790_v42  ;;  %v4835_v43 = vld [vmem:[#allocation122_spill] sm:$0xff]  ;;  %v4836_v42 = vld [vmem:[#allocation121_spill] sm:$0xff] }
 0x549   : > { %1834 = vmatprep.subr.mxu1 %v4791_v50  ;;  %2623 = vmatprep.subr.mxu0 %v4648_v34  ;;  %v4837_v50 = vld [vmem:[#allocation123_spill] sm:$0xff] }
 0x54a   : > { %1835 = vmatpush1.msra.mxu1 %v4792_v54  ;;  %2624 = vmatpush3.msra.mxu0 %v4793_v55  ;;  %v4838_v54 = vld [vmem:[#allocation125_spill] sm:$0xff]  ;;  %v4839_v55 = vld [vmem:[#allocation124_spill] sm:$0xff] }
 0x54b   : > { %1836 = vmatprep.subr.mxu1 %v4794_v57  ;;  %2625 = vmatprep.subr.mxu0 %v4648_v34  ;;  %v4840_v57 = vld [vmem:[#allocation126_spill] sm:$0xff] }
 0x54c   : > { %1837 = vmatpush1.msra.mxu1 %v4795_v58  ;;  %2626 = vmatpush3.msra.mxu0 %v4796_v4  ;;  %v4841_v58 = vld [vmem:[#allocation128_spill] sm:$0xff]  ;;  %v4842_v4 = vld [vmem:[#allocation127_spill] sm:$0xff] }
 0x54d   : > { %1838 = vmatprep.subr.mxu1 %v4797_v9  ;;  %2627 = vmatprep.subr.mxu0 %v4648_v34  ;;  %v4843_v9 = vld [vmem:[#allocation129_spill] sm:$0xff] }
 0x54e   : > { %1839 = vmatpush1.msra.mxu1 %v4798_v15  ;;  %2628 = vmatpush3.msra.mxu0 %v4799_v16  ;;  %v4844_v15 = vld [vmem:[#allocation131_spill] sm:$0xff]  ;;  %v4845_v16 = vld [vmem:[#allocation130_spill] sm:$0xff] }
 0x54f   : > { %1840 = vmatprep.subr.mxu1 %v4800_v17  ;;  %2629 = vmatprep.subr.mxu0 %v4648_v34  ;;  %v4846_v17 = vld [vmem:[#allocation132_spill] sm:$0xff] }
 0x550   : > { %1841 = vmatpush1.msra.mxu1 %v4801_v18  ;;  %2630 = vmatpush3.msra.mxu0 %v4802_v19  ;;  %v4847_v18 = vld [vmem:[#allocation134_spill] sm:$0xff]  ;;  %v4848_v19 = vld [vmem:[#allocation133_spill] sm:$0xff] }
 0x551   : > { %1842 = vmatprep.subr.mxu1 %v4803_v20  ;;  %2631 = vmatprep.subr.mxu0 %v4648_v34  ;;  %v4849_v20 = vld [vmem:[#allocation135_spill] sm:$0xff] }
 0x552   : > { %1843 = vmatpush1.msra.mxu1 %v4804_v21  ;;  %2632 = vmatpush3.msra.mxu0 %v4805_v23  ;;  %v4850_v21 = vld [vmem:[#allocation137_spill] sm:$0xff]  ;;  %v4851_v23 = vld [vmem:[#allocation136_spill] sm:$0xff] }
 0x553   : > { %1844 = vmatprep.subr.mxu1 %v4806_v24  ;;  %2633 = vmatprep.subr.mxu0 %v4648_v34  ;;  %v4852_v24 = vld [vmem:[#allocation138_spill] sm:$0xff] }
 0x554   : > { %1845 = vmatpush1.msra.mxu1 %v4807_v26  ;;  %2634 = vmatpush3.msra.mxu0 %v4808_v27  ;;  %v4853_v26 = vld [vmem:[#allocation140_spill] sm:$0xff]  ;;  %v4854_v27 = vld [vmem:[#allocation139_spill] sm:$0xff] }
 0x555   : > { %1846 = vmatprep.subr.mxu1 %v4809_v28  ;;  %2635 = vmatprep.subr.mxu0 %v4648_v34  ;;  %v4855_v28 = vld [vmem:[#allocation141_spill] sm:$0xff] }
 0x556   : > { %1847 = vmatpush1.msra.mxu1 %v4810_v29  ;;  %2636 = vmatpush3.msra.mxu0 %v4811_v30  ;;  %v4856_v29 = vld [vmem:[#allocation143_spill] sm:$0xff]  ;;  %v4857_v30 = vld [vmem:[#allocation142_spill] sm:$0xff] }
 0x557   : > { %1848 = vmatprep.subr.mxu1 %v4812_v31  ;;  %2637 = vmatprep.subr.mxu0 %v4648_v34  ;;  %v4858_v31 = vld [vmem:[#allocation144_spill] sm:$0xff] }
 0x558   : > { %1849 = vmatpush1.msra.mxu1 %v4813_v32  ;;  %2638 = vmatpush3.msra.mxu0 %v4814_v1  ;;  %v4859_v32 = vld [vmem:[#allocation146_spill] sm:$0xff]  ;;  %v4860_v1 = vld [vmem:[#allocation145_spill] sm:$0xff] }
 0x559   : > { %1850 = vmatprep.subr.mxu1 %v4815_v51  ;;  %2639 = vmatprep.subr.mxu0 %v4648_v34  ;;  %v4861_v51 = vld [vmem:[#allocation147_spill] sm:$0xff] }
 0x55a   : > { %1851 = vmatpush1.msra.mxu1 %v3874_v37  ;;  %2640 = vmatpush3.msra.mxu0 %v4816_v2  ;;  %v4824_v37 = vld [vmem:[#allocation110_spill] sm:$0xff]  ;;  %v4862_v2 = vld [vmem:[#allocation149_spill] sm:$0xff] }
 0x55b   : > { %1852 = vmatprep.subr.mxu1 %v4817_v3  ;;  %2641 = vmatprep.subr.mxu0 %v4648_v34  ;;  %v1612_v33 = vadd.f32 %v4824_v37, %v4236_v8  ;;  %v4830_v8 = vld [vmem:[#allocation115_spill] sm:$0xff]  ;;  %v4863_v3 = vld [vmem:[#allocation148_spill] sm:$0xff] }
 0x55c   : > { %1853 = vmatpush1.msra.mxu1 %v4818_v5  ;;  %2642 = vmatpush3.msra.mxu0 %v4819_v6  ;;  %v4864_v5 = vld [vmem:[#allocation150_spill] sm:$0xff]  ;;  %v4865_v6 = vld [vmem:[#allocation151_spill] sm:$0xff] }
 0x55d   : > { %1854 = vmatprep.subr.mxu1 %v4820_v7  ;;  %2643 = vmatprep.subr.mxu0 %v4648_v34 }
 0x55e   : > { %1855 = vmatpush1.msra.mxu1 %v4821_v11  ;;  %2644 = vmatpush3.msra.mxu0 %v4822_v14 }
 0x55f   : > { %1856 = vmatprep.subr.mxu1 %v4823_v48  ;;  %2645 = vmatprep.subr.mxu0 %v4648_v34 }
 0x560   : > { %1857 = vmatpush1.msra.mxu1 %v4825_v61  ;;  %1890 = vmatprep.mubr.f32.mxu1 %v4648_v34 }
 0x561   : > { %2646 = vmatpush3.msra.mxu0 %v4826_v62  ;;  %2647 = vmatprep.mubr.msk.f32.mxu0 %vm3127_vm0, %v4648_v34 }
 0x562   : > { %1891 = vmatmul.mubr.f32.vlgmr.msra.gmra.mxu1 %v1612_v33  ;;  %2648 = vmatmul.mubr.f32.vlgmr.msra.gmra.mxu0 %v1612_v33 }
 0x563   : > { %1970 = vmatprep.subr.mxu1 %v4827_v63  ;;  %2650 = vmatprep.subr.mxu0 %v4648_v34 }
 0x564   : > { %1971 = vmatpush1.msra.mxu1 %v4828_v47  ;;  %2651 = vmatpush3.msra.mxu0 %v4829_v0 }
 0x565   : > { %1972 = vmatprep.subr.mxu1 %v4830_v8  ;;  %2652 = vmatprep.subr.mxu0 %v4648_v34 }
 0x566   : > { %1973 = vmatpush1.msra.mxu1 %v4831_v46  ;;  %2653 = vmatpush3.msra.mxu0 %v4832_v53 }
 0x567   : > { %1974 = vmatprep.subr.mxu1 %v4833_v45  ;;  %2654 = vmatprep.subr.mxu0 %v4648_v34 }
 0x568   : > { %1975 = vmatpush1.msra.mxu1 %v4834_v44  ;;  %2655 = vmatpush3.msra.mxu0 %v4835_v43 }
 0x569   : > { %1976 = vmatprep.subr.mxu1 %v4836_v42  ;;  %2656 = vmatprep.subr.mxu0 %v4648_v34 }
 0x56a   : > { %1977 = vmatpush1.msra.mxu1 %v4837_v50  ;;  %2657 = vmatpush3.msra.mxu0 %v4838_v54 }
 0x56b   : > { %1978 = vmatprep.subr.mxu1 %v4839_v55  ;;  %2658 = vmatprep.subr.mxu0 %v4648_v34 }
 0x56c   : > { %1979 = vmatpush1.msra.mxu1 %v4840_v57  ;;  %2659 = vmatpush3.msra.mxu0 %v4841_v58 }
 0x56d   : > { %1980 = vmatprep.subr.mxu1 %v4842_v4  ;;  %2660 = vmatprep.subr.mxu0 %v4648_v34 }
 0x56e   : > { %1981 = vmatpush1.msra.mxu1 %v4843_v9  ;;  %2661 = vmatpush3.msra.mxu0 %v4844_v15 }
 0x56f   : > { %1982 = vmatprep.subr.mxu1 %v4845_v16  ;;  %2662 = vmatprep.subr.mxu0 %v4648_v34 }
 0x570   : > { %1983 = vmatpush1.msra.mxu1 %v4846_v17  ;;  %2663 = vmatpush3.msra.mxu0 %v4847_v18 }
 0x571   : > { %1984 = vmatprep.subr.mxu1 %v4848_v19  ;;  %2664 = vmatprep.subr.mxu0 %v4648_v34 }
 0x572   : > { %1985 = vmatpush1.msra.mxu1 %v4849_v20  ;;  %2665 = vmatpush3.msra.mxu0 %v4850_v21 }
 0x573   : > { %1986 = vmatprep.subr.mxu1 %v4851_v23  ;;  %2666 = vmatprep.subr.mxu0 %v4648_v34 }
 0x574   : > { %1987 = vmatpush1.msra.mxu1 %v4852_v24  ;;  %2667 = vmatpush3.msra.mxu0 %v4853_v26 }
 0x575   : > { %1988 = vmatprep.subr.mxu1 %v4854_v27  ;;  %2668 = vmatprep.subr.mxu0 %v4648_v34 }
 0x576   : > { %1989 = vmatpush1.msra.mxu1 %v4855_v28  ;;  %2669 = vmatpush3.msra.mxu0 %v4856_v29 }
 0x577   : > { %1990 = vmatprep.subr.mxu1 %v4857_v30  ;;  %2670 = vmatprep.subr.mxu0 %v4648_v34 }
 0x578   : > { %1991 = vmatpush1.msra.mxu1 %v4858_v31  ;;  %2671 = vmatpush3.msra.mxu0 %v4859_v32 }
 0x579   : > { %1992 = vmatprep.subr.mxu1 %v4860_v1  ;;  %2672 = vmatprep.subr.mxu0 %v4648_v34 }
 0x57a   : > { %1993 = vmatpush1.msra.mxu1 %v4861_v51  ;;  %2673 = vmatpush3.msra.mxu0 %v4862_v2 }
 0x57b   : > { %1994 = vmatprep.subr.mxu1 %v4863_v3  ;;  %2674 = vmatprep.subr.mxu0 %v4648_v34 }
 0x57c   : > { %1995 = vmatpush1.msra.mxu1 %v4864_v5  ;;  %2675 = vmatpush3.msra.mxu0 %v4050_v36 }
 0x57d   : > { %1996 = vmatprep.subr.mxu1 %v4865_v6  ;;  %2676 = vmatprep.subr.mxu0 %v4648_v34 }
 0x57e   : > { %1997 = vmatpush1.msra.mxu1 %v4053_v56  ;;  %2677 = vmatpush3.msra.mxu0 %v4060_v40 }
 0x57f   : > { %1998 = vmatprep.subr.mxu1 %v4057_v35  ;;  %2678 = vmatprep.subr.mxu0 %v4648_v34 }
 0x580   : > { %1999 = vmatpush1.msra.mxu1 %v4063_v60  ;;  %2679 = vmatpush3.msra.mxu0 %v4070_v52 }
 0x581   : > { %2000 = vmatprep.subr.mxu1 %v4067_v41  ;;  %2680 = vmatprep.subr.mxu0 %v4648_v34 }
 0x582   : > { %2001 = vmatpush1.msra.mxu1 %v4073_v39  ;;  %2034 = vmatprep.mubr.f32.mxu1 %v4648_v34 }
 0x583   : > { %2681 = vmatpush3.msra.mxu0 %v4078_v38  ;;  %2682 = vmatprep.mubr.msk.f32.mxu0 %vm3127_vm0, %v4648_v34 }
 0x584   : > { %2035 = vmatmul.mubr.f32.vlgmr.msra.gmra.mxu1 %v4156_v10  ;;  %2683 = vmatmul.mubr.f32.vlgmr.msra.gmra.mxu0 %v4156_v10 }
 0x601   : > { %v1822_v35 = vpop.f32.mrf.mxu0  ;;  %v1751_v56 = vpop.f32.mrf.mxu1 }
 0x603   : > { %v2614_v40 = vpop.f32.mrf.mxu0  ;;  %v1753_v60 = vpop.f32.mrf.mxu1 }
 0x622   : > { %v1963_v52 = vpop.f32.mrf.mxu0  ;;  %v1892_v7 = vpop.f32.mrf.mxu1 }
 0x623   : > { %v1964_v36 = vadd.f32 %v1963_v52, %v1822_v35  ;;  %v1893_v39 = vadd.f32 %v1892_v7, %v1751_v56 }
 0x624   : > { %v2649_v41 = vpop.f32.mrf.mxu0  ;;  %v1894_v11 = vpop.f32.mrf.mxu1 }
 0x625   : > { %v1967_v38 = vadd.f32 %v1893_v39, %v4133_v12  ;;  %v1895_v63 = vadd.f32 %v1894_v11, %v1753_v60  ;;  %v1969_v43 = vadd.f32 %v1964_v36, %v4151_v59 }
 0x627   : > { %v1968_v0 = vadd.f32 %v1895_v63, %v4144_v25 }
 0x644   : > { %v2036_v14 = vpop.f32.mrf.mxu1  ;;  %v2107_v48 = vpop.f32.mrf.mxu0 }
 0x645   : > { %v2037_v34 = vadd.f32 %v2036_v14, %v4136_v13  ;;  %v2108_v13 = vadd.f32 %v2107_v48, %v4149_v49 }
 0x646   : > { %v2684_v37 = vpop.f32.mrf.mxu0  ;;  %v2038_v62 = vpop.f32.mrf.mxu1 }
 0x647   : > { %v2111_v33 = vadd.f32 %v2037_v34, %v1967_v38  ;;  %v2039_v47 = vadd.f32 %v2038_v62, %v4141_v22 }
 0x649   : > { %v2339_v61 = vmul.f32 -1.442695, %v2111_v33  ;;  %v2118_v8 = vadd.f32 %v2039_v47, %v1968_v0 }
 0x64b   : > { %2808 = vpow2.f32 %v2339_v61  ;;  %v2340_v46 = vmul.f32 -1.442695, %v2118_v8 }
 0x64d   : > { %2810 = vpow2.f32 %v2340_v46 }
 0x658   : > { %v2809_v53 = vpop.eup %2808 }
 0x659   : > { %v2115_v45 = vadd.f32 1.0, %v2809_v53 }
 0x65a   : > { %v2811_v12 = vpop.eup %2810 }
 0x65b   : > { %2812 = vrcp.f32 %v2115_v45  ;;  %v2122_v22 = vadd.f32 1.0, %v2811_v12 }
 0x668   : > { %v2813_v44 = vpop.eup %2812 }
 0x669   : > { %v2125_v42 = vmul.f32 %v2813_v44, %v2108_v13 }
 0x66b   : > { %v2126_v50 = vadd.f32 %v2125_v42, %v1969_v43 }
 0x66d   : > { %2814 = vtanh.f32 %v2126_v50 }
 0x66e   : > { %2816 = vrcp.f32 %v2122_v22 }
 0x67a   : > { %v2815_v25 = vpop.eup %2814 }
 0x67b   : > { %v2128_v54 = vsub.f32 %v4156_v10, %v2815_v25  ;;  %v2817_v55 = vpop.eup %2816 }
 0x67d   : > { %v2129_v57 = vmul.f32 %v2817_v55, %v2128_v54 }
 0x67f   : > { %v2130_v58 = vadd.f32 %v2815_v25, %v2129_v57 }
 0x681   : > { %2131 = vst [vmem:[%s570_s30] sm:$0xff] %v2130_v58 }
 0x682   : > { %3045 = shalt.err (!%p3042_p6)
}
 0x683   : > { %s3046_s13 = scalar_lea.hbm %s2144_s26, 128  ;;  %s3050_s3 = scalar_lea.hbm %s4867_s28, 256 }
 0x684   : > { %p3047_p1 = scmp.ne.s32.totalorder %s2144_s26, %s3046_s13  ;;  %p3051_p9 = scmp.lt.s32.totalorder %s2144_s26, %s4867_s28 }
 0x685   : > { %p3052_p4 = scmp.lt.s32.totalorder %s3050_s3, %s3046_s13 }
 0x686   : > { %p3048_p5 = pnand %p3047_p1, %p4868_p11 }
 0x687   : > { %p3053_p7 = por %p3052_p4, %p3051_p9 }
 0x688   : > { %p3049_p8 = pneg %p3048_p5 }
 0x68a   : > { %p3054_p2 = pnand %p3053_p7, %p3049_p8 }
 0x68c   : > { %3057 = shalt.err (!%p3054_p2)
}
 0x68d   : > { %2711 = dma.vmem_to_hbm [thread:$0]  (%p4868_p11), %s2147_s21, 128, %s2144_s26, %s2133_s11  }
 0x68e PF: > { %s4869_s17 = sld [smem:[#allocation23_spill]] }
 0x68f   : > { %s4870_s25 = sld [smem:[#allocation28_spill]] }
 0x690   : > { %s4871_s19 = sld [smem:[#allocation24_spill]] }
 0x694   : > { %s2158_s16 = sand.u32 1, %s4869_s17  }
 0x695   : > { %p4872_p13 = scmp.ne.s32.totalorder %s4870_s25, 0  ;;  %s2159_s30 = scalar_lea.sflag [#allocation4], %s2158_s16 }
 0x696   : > { %p4873_p12 = scmp.ge.s32.totalorder %s4871_s19, 2 }
 0x698   : > { %p2740_p3 = pnand %p4873_p12, %p4872_p13 }
 0x69a   : > { %p2741_p10 = pneg %p2740_p3 }
 0x69c   : > { %3095 = dma.done.wait (%p2741_p10), %s2159_s30, 128  }
 0x69d   : > { %3097 = vsyncadd (%p2741_p10), %s2159_s30, 4294967168  ;;  %s4874_s24 = sld [smem:[#allocation25_spill]]  ;;  %s4876_s21 = smov %s3104_s22 }
 0x69e   : > { %s4875_s9 = sld [smem:[#allocation26_spill]]  ;;  %s4877_s22 = smov %s3108_s23 }
 0x6a3   : > { %p31_p0 = scmp.ge.s32.totalorder %s4874_s24, 4  }
 0x6a4   : > { %s4878_s23 = smov %s4875_s9 }
 0x6a5   :  { %33 = sbr.rel (!%p31_p0) target bundleno = 17 (0x11), region = 157 }
 0x6aa   :  { %2164 = vsyncpa [#allocation3], 1 }
 0x6ab   :  { %2166 = vsyncpa [#allocation3 + $0x1], 1 }
 0x6ac   :  { %2167 = vsyncpa [#allocation6], 1 }
 0x6ad   :  { %2169 = vsyncpa [#allocation6 + $0x1], 1 }
 0x6ae   :  { %2170 = vsyncpa [#allocation9], 1 }
 0x6af   :  { %2171 = vsyncpa [#allocation12], 1 }
 0x6b0   :  { %2172 = vsyncpa [#allocation15], 1 }
 0x6b1   :  { %2173 = vsyncpa [#allocation4], 1 }
 0x6b2   :  { %2175 = vsyncpa [#allocation4 + $0x1], 1 }

</bundles_post_ra>
